<compile_context>
chip_gen: v6e
topology: v6e:2x2x1
jax: 0.10.0
libtpu: 0.0.40
codegen_flags: <defaults>
</compile_context>

<pallas_src>
import functools
import math

import jax
import jax.numpy as jnp
from jax.experimental import pallas as pl
from jax.experimental.pallas import tpu as pltpu


# ----------------------------------------------------------------------------
# helpers
# ----------------------------------------------------------------------------
def _gelu_exact(x):
    # Matches torch.nn.GELU() (exact erf form).
    return 0.5 * x * (1.0 + jax.lax.erf(x * (1.0 / math.sqrt(2.0))))


def _pick_tile(dim, cap, align):
    """Largest `align`-aligned divisor of `dim` that is <= cap, else full dim.

    Full dim is always a legal block shape; an aligned divisor keeps the tile
    within VMEM for big dims.  Never returns an unaligned partial tile.
    """
    if dim <= cap:
        return dim
    t = (cap // align) * align
    while t >= align:
        if dim % t == 0:
            return t
        t -= align
    return dim  # no aligned divisor <= cap: fall back to full extent (legal)


# ----------------------------------------------------------------------------
# dense matmul kernel: y = epilogue(x @ W + b)
#   epilogue = identity | GELU | residual-add + LayerNorm
# ----------------------------------------------------------------------------
def _dense_kernel(*refs, activation, fuse_ln, eps):
    if fuse_ln:
        x_ref, w_ref, b_ref, res_ref, g_ref, bt_ref, o_ref, acc_ref = refs
    else:
        x_ref, w_ref, b_ref, o_ref, acc_ref = refs
        res_ref = g_ref = bt_ref = None

    k = pl.program_id(2)

    @pl.when(k == 0)
    def _init():
        acc_ref[...] = jnp.zeros_like(acc_ref)

    acc_ref[...] += jnp.dot(
        x_ref[...], w_ref[...], preferred_element_type=jnp.float32
    )

    @pl.when(k == pl.num_programs(2) - 1)
    def _finalize():
        y = acc_ref[...] + b_ref[...]
        if activation == "gelu":
            y = _gelu_exact(y)
        if fuse_ln:
            y = y + res_ref[...].astype(jnp.float32)
            mu = jnp.mean(y, axis=-1, keepdims=True)
            yc = y - mu
            var = jnp.mean(yc * yc, axis=-1, keepdims=True)
            y = yc * jax.lax.rsqrt(var + eps) * g_ref[...] + bt_ref[...]
        o_ref[...] = y.astype(o_ref.dtype)


def dense(x, w, b, *, activation=None, residual=None, gamma=None, beta=None,
          eps=1e-12, out_dtype=None, tm_cap=256, tn_cap=512, tk_cap=512):
    """x: [M, K], w: [K, N], b: [N].  Optional fused residual+LayerNorm epilogue."""
    M, K = x.shape
    Kw, N = w.shape
    assert K == Kw
    fuse_ln = residual is not None
    out_dtype = out_dtype if out_dtype is not None else x.dtype

    tm = _pick_tile(M, tm_cap, 8)
    tk = _pick_tile(K, tk_cap, 128)
    # LayerNorm needs the full output row resident -> full-width N tile.
    tn = N if fuse_ln else _pick_tile(N, tn_cap, 128)

    grid = (M // tm, N // tn, K // tk)

    in_specs = [
        pl.BlockSpec((tm, tk), lambda i, j, k: (i, k)),
        pl.BlockSpec((tk, tn), lambda i, j, k: (k, j)),
        pl.BlockSpec((1, tn), lambda i, j, k: (0, j)),
    ]
    args = [x, w, b.reshape(1, N).astype(jnp.float32)]
    if fuse_ln:
        in_specs += [
            pl.BlockSpec((tm, tn), lambda i, j, k: (i, j)),
            pl.BlockSpec((1, tn), lambda i, j, k: (0, j)),
            pl.BlockSpec((1, tn), lambda i, j, k: (0, j)),
        ]
        args += [
            residual,
            gamma.reshape(1, N).astype(jnp.float32),
            beta.reshape(1, N).astype(jnp.float32),
        ]

    kernel = functools.partial(
        _dense_kernel, activation=activation, fuse_ln=fuse_ln, eps=eps
    )
    return pl.pallas_call(
        kernel,
        grid=grid,
        out_shape=jax.ShapeDtypeStruct((M, N), out_dtype),
        in_specs=in_specs,
        out_specs=pl.BlockSpec((tm, tn), lambda i, j, k: (i, j)),
        scratch_shapes=[pltpu.VMEM((tm, tn), jnp.float32)],
        compiler_params=pltpu.CompilerParams(
            dimension_semantics=("parallel", "parallel", "arbitrary")
        ),
    )(*args)


# ----------------------------------------------------------------------------
# standalone LayerNorm (used once, after the embedding sum; no residual read)
# ----------------------------------------------------------------------------
def _ln_kernel(x_ref, g_ref, b_ref, o_ref, *, eps):
    x = x_ref[...].astype(jnp.float32)
    mu = jnp.mean(x, axis=-1, keepdims=True)
    xc = x - mu
    var = jnp.mean(xc * xc, axis=-1, keepdims=True)
    y = xc * jax.lax.rsqrt(var + eps) * g_ref[...] + b_ref[...]
    o_ref[...] = y.astype(o_ref.dtype)


def layer_norm(x, gamma, beta, *, eps=1e-12, out_dtype=None):
    M, H = x.shape
    tm = _pick_tile(M, 256, 8)
    out_dtype = out_dtype if out_dtype is not None else x.dtype
    return pl.pallas_call(
        functools.partial(_ln_kernel, eps=eps),
        grid=(M // tm,),
        out_shape=jax.ShapeDtypeStruct((M, H), out_dtype),
        in_specs=[
            pl.BlockSpec((tm, H), lambda i: (i, 0)),
            pl.BlockSpec((1, H), lambda i: (0, 0)),
            pl.BlockSpec((1, H), lambda i: (0, 0)),
        ],
        out_specs=pl.BlockSpec((tm, H), lambda i: (i, 0)),
        compiler_params=pltpu.CompilerParams(dimension_semantics=("parallel",)),
    )(x, gamma.reshape(1, H).astype(jnp.float32),
      beta.reshape(1, H).astype(jnp.float32))


# ----------------------------------------------------------------------------
# attention: one grid step per batch element, all heads computed in-kernel
# ----------------------------------------------------------------------------
def _attn_kernel(qkv_ref, m_ref, o_ref, *, n_heads, scale):
    H3 = qkv_ref.shape[-1]
    H = H3 // 3
    dh = H // n_heads

    qkv = qkv_ref[0]          # (S, 3H) bf16
    mask = m_ref[0]           # (1, S)  f32 additive (0 / -1e9)

    ctx_heads = []
    for h in range(n_heads):  # static unroll; head split = static lane slices
        q = qkv[:, h * dh:(h + 1) * dh]
        k = qkv[:, H + h * dh:H + (h + 1) * dh]
        v = qkv[:, 2 * H + h * dh:2 * H + (h + 1) * dh]

        s = jax.lax.dot_general(q, k, (((1,), (1,)), ((), ())),
                                preferred_element_type=jnp.float32)
        s = s * scale + mask                              # (S, S) f32
        s = s - jnp.max(s, axis=-1, keepdims=True)
        p = jnp.exp(s)
        p = p * pl.reciprocal(jnp.sum(p, axis=-1, keepdims=True), approx=True)
        ctx_heads.append(jnp.dot(p.astype(qkv.dtype), v,
                                 preferred_element_type=jnp.float32))

    # one lane-dense [S, H] store per grid step
    o_ref[0] = jnp.concatenate(ctx_heads, axis=-1).astype(o_ref.dtype)


def attention(qkv, add_mask, n_heads):
    """qkv: [B, S, 3H] bf16; add_mask: [B, 1, S] f32 additive -> [B, S, H] bf16."""
    B, S, H3 = qkv.shape
    H = H3 // 3
    dh = H // n_heads
    scale = 1.0 / math.sqrt(dh)
    # TODO(synk): full flash-style q/kv tiling for long sequences not implemented;
    # the whole (S, S) score block per head lives in VMEM (fine for BERT S<=512).
    return pl.pallas_call(
        functools.partial(_attn_kernel, n_heads=n_heads, scale=scale),
        grid=(B,),
        out_shape=jax.ShapeDtypeStruct((B, S, H), qkv.dtype),
        in_specs=[
            pl.BlockSpec((1, S, H3), lambda b: (b, 0, 0)),
            pl.BlockSpec((1, 1, S), lambda b: (b, 0, 0)),
        ],
        out_specs=pl.BlockSpec((1, S, H), lambda b: (b, 0, 0)),
        compiler_params=pltpu.CompilerParams(dimension_semantics=("parallel",)),
    )(qkv, add_mask)


# ----------------------------------------------------------------------------
# model glue (plain JAX): embedding gather, reshapes, layer stacking
# ----------------------------------------------------------------------------
def encoder_layer(p, x2, add_mask, batch, seq, n_heads):
    hidden = x2.shape[1]

    # fused QKV projection: one [H, 3H] matmul
    qkv = dense(x2, p["w_qkv"], p["b_qkv"])                          # [B*S, 3H]
    ctx = attention(qkv.reshape(batch, seq, 3 * hidden), add_mask, n_heads)

    # attention output projection + residual + LayerNorm fused in one kernel
    x2 = dense(ctx.reshape(batch * seq, hidden), p["wo"], p["bo"],
               residual=x2, gamma=p["ln1_g"], beta=p["ln1_b"])

    # FFN: GELU fused into first matmul; residual+LN fused into second
    inter = dense(x2, p["w_ff1"], p["b_ff1"], activation="gelu")
    x2 = dense(inter, p["w_ff2"], p["b_ff2"],
               residual=x2, gamma=p["ln2_g"], beta=p["ln2_b"])
    return x2


def bert_classifier_forward(params, input_ids, attention_mask, *, n_heads, n_classes):
    batch, seq = input_ids.shape
    hidden = params["word_emb"].shape[1]

    # TODO(synk): embedding gather stays in plain JAX (data-dependent gather has
    # no rectangular BlockSpec form); everything downstream runs in Pallas.
    x = (params["word_emb"][input_ids]
         + params["pos_emb"][:seq][None, :, :]
         + params["type_emb"][0][None, None, :])                     # [B, S, H] f32
    x2 = layer_norm(x.reshape(batch * seq, hidden),
                    params["emb_ln_g"], params["emb_ln_b"],
                    out_dtype=jnp.bfloat16)

    # HF-style additive mask, kept in f32: 0 where attended, -1e9 where masked.
    add_mask = ((1.0 - attention_mask.astype(jnp.float32)) * -1e9
                ).reshape(batch, 1, seq)

    for lyr in params["layers"]:
        x2 = encoder_layer(lyr, x2, add_mask, batch, seq, n_heads)

    # dropout1 / dropout2 / classifier dropout are identity in eval mode.
    h = dense(x2, params["cls_w1"], params["cls_b1"], activation="gelu")
    # classifier output padded to 128 lanes for lane-dense stores; sliced after.
    logits_p = dense(h, params["cls_w2_pad"], params["cls_b2_pad"],
                     out_dtype=jnp.float32)
    return logits_p[:, :n_classes].reshape(batch, seq, n_classes)


# ----------------------------------------------------------------------------
# deterministic parameter init (bf16 matmul weights, f32 biases / LN / embeddings)
# ----------------------------------------------------------------------------
def init_params(key, vocab, max_pos, hidden, inter, n_layers, n_classes):
    keys = iter(jax.random.split(key, 8 + 6 * n_layers))

    def nrm(shape, dtype=jnp.bfloat16):
        return (jax.random.normal(next(keys), shape, jnp.float32) * 0.02).astype(dtype)

    n_cls_pad = ((n_classes + 127) // 128) * 128
    w2 = jax.random.normal(next(keys), (hidden, n_classes), jnp.float32) * 0.02
    w2_pad = jnp.zeros((hidden, n_cls_pad), jnp.float32).at[:, :n_classes].set(w2)

    params = {
        "word_emb": nrm((vocab, hidden), jnp.float32),
        "pos_emb": nrm((max_pos, hidden), jnp.float32),
        "type_emb": nrm((2, hidden), jnp.float32),
        "emb_ln_g": jnp.ones((hidden,), jnp.float32),
        "emb_ln_b": jnp.zeros((hidden,), jnp.float32),
        "layers": [],
        "cls_w1": nrm((hidden, hidden)),
        "cls_b1": jnp.zeros((hidden,), jnp.float32),
        "cls_w2_pad": w2_pad.astype(jnp.bfloat16),
        "cls_b2_pad": jnp.zeros((n_cls_pad,), jnp.float32),
    }
    for _ in range(n_layers):
        params["layers"].append({
            "w_qkv": nrm((hidden, 3 * hidden)),
            "b_qkv": jnp.zeros((3 * hidden,), jnp.float32),
            "wo": nrm((hidden, hidden)),
            "bo": jnp.zeros((hidden,), jnp.float32),
            "ln1_g": jnp.ones((hidden,), jnp.float32),
            "ln1_b": jnp.zeros((hidden,), jnp.float32),
            "w_ff1": nrm((hidden, inter)),
            "b_ff1": jnp.zeros((inter,), jnp.float32),
            "w_ff2": nrm((inter, hidden)),
            "b_ff2": jnp.zeros((hidden,), jnp.float32),
            "ln2_g": jnp.ones((hidden,), jnp.float32),
            "ln2_b": jnp.zeros((hidden,), jnp.float32),
        })
    return params


# ----------------------------------------------------------------------------
if __name__ == "__main__":
    BATCH, SEQ, HIDDEN, N_HEADS = 2, 8, 32, 2
    INTER, N_LAYERS, VOCAB, MAX_POS, N_CLASSES = 64, 2, 100, 32, 4

    root = jax.random.PRNGKey(0)
    k_params, k_ids = jax.random.split(root)

    params = init_params(k_params, VOCAB, MAX_POS, HIDDEN, INTER, N_LAYERS, N_CLASSES)
    input_ids = jax.random.randint(k_ids, (BATCH, SEQ), 0, VOCAB, dtype=jnp.int32)
    attention_mask = jnp.ones((BATCH, SEQ), dtype=jnp.int32).at[1, 6:].set(0)

    fwd = jax.jit(functools.partial(bert_classifier_forward,
                                    n_heads=N_HEADS, n_classes=N_CLASSES))
    logits = fwd(params, input_ids, attention_mask)
    jax.block_until_ready(logits)

    assert logits.shape == (BATCH, SEQ, N_CLASSES), logits.shape
    assert logits.dtype == jnp.float32
    assert bool(jnp.all(jnp.isfinite(logits)))
    print("KERNEL_OK")
</pallas_src>

<mosaic_0001>
module attributes {stable_mosaic.version = 11 : i64} {
  func.func @_attn_kernel(%arg0: i32, %arg1: memref<1x8x96xbf16, #tpu.memory_space<vmem>>, %arg2: memref<1x1x8xf32, #tpu.memory_space<vmem>>, %arg3: memref<1x8x32xbf16, #tpu.memory_space<vmem>>) attributes {dimension_semantics = [#tpu.dimension_semantics<parallel>], iteration_bounds = array<i64: 2>, scalar_prefetch = 0 : i64, scratch_operands = 0 : i64, tpu.core_type = #tpu.core_type<tc>, window_params = [{transform_indices = @transform_0, window_bounds = array<i64: 1, 8, 96>}, {transform_indices = @transform_1, window_bounds = array<i64: 1, 1, 8>}, {transform_indices = @transform_2, window_bounds = array<i64: 1, 8, 32>}]} {
    %c0 = arith.constant 0 : index
    %c0_0 = arith.constant 0 : index
    %c0_1 = arith.constant 0 : index
    %0 = vector.load %arg1[%c0, %c0_0, %c0_1] : memref<1x8x96xbf16, #tpu.memory_space<vmem>>, vector<1x8x96xbf16>
    %1 = vector.shape_cast %0 : vector<1x8x96xbf16> to vector<8x96xbf16>
    %c0_2 = arith.constant 0 : index
    %c0_3 = arith.constant 0 : index
    %c0_4 = arith.constant 0 : index
    %2 = vector.load %arg2[%c0_2, %c0_3, %c0_4] : memref<1x1x8xf32, #tpu.memory_space<vmem>>, vector<1x1x8xf32>
    %3 = vector.shape_cast %2 : vector<1x1x8xf32> to vector<1x8xf32>
    %4 = vector.extract_strided_slice %1 {offsets = [0, 0], sizes = [8, 16], strides = [1, 1]} : vector<8x96xbf16> to vector<8x16xbf16>
    %5 = vector.extract_strided_slice %1 {offsets = [0, 32], sizes = [8, 16], strides = [1, 1]} : vector<8x96xbf16> to vector<8x16xbf16>
    %6 = vector.extract_strided_slice %1 {offsets = [0, 64], sizes = [8, 16], strides = [1, 1]} : vector<8x96xbf16> to vector<8x16xbf16>
    %cst = arith.constant dense<0.000000e+00> : vector<8x8xf32>
    %7 = tpu.matmul %4, %5, %cst {dimension_numbers = #tpu.dot_dimension_numbers<[1], [1], [0], [0], [0, 0, 1, 0], [], []>} : vector<8x16xbf16>, vector<8x16xbf16>, vector<8x8xf32> -> vector<8x8xf32>
    %cst_5 = arith.constant 2.500000e-01 : f32
    %8 = vector.broadcast %cst_5 : f32 to vector<8x8xf32>
    %9 = arith.mulf %7, %8 : vector<8x8xf32>
    %10 = vector.broadcast %3 : vector<1x8xf32> to vector<8x8xf32>
    %11 = arith.addf %9, %10 : vector<8x8xf32>
    %cst_6 = arith.constant dense<0xFF800000> : vector<8xf32>
    %12 = vector.multi_reduction <maximumf>, %11, %cst_6 [1] : vector<8x8xf32> to vector<8xf32>
    %13 = vector.shape_cast %12 : vector<8xf32> to vector<8x1xf32>
    %14 = vector.broadcast %13 : vector<8x1xf32> to vector<8x8xf32>
    %15 = arith.subf %11, %14 : vector<8x8xf32>
    %16 = math.exp %15 : vector<8x8xf32>
    %cst_7 = arith.constant dense<0.000000e+00> : vector<8xf32>
    %17 = vector.multi_reduction <add>, %16, %cst_7 [1] : vector<8x8xf32> to vector<8xf32>
    %18 = vector.shape_cast %17 : vector<8xf32> to vector<8x1xf32>
    %19 = tpu.reciprocal %18 {approx = true} : vector<8x1xf32> -> vector<8x1xf32>
    %20 = vector.broadcast %19 : vector<8x1xf32> to vector<8x8xf32>
    %21 = arith.mulf %16, %20 : vector<8x8xf32>
    %22 = arith.truncf %21 : vector<8x8xf32> to vector<8x8xbf16>
    %cst_8 = arith.constant dense<0.000000e+00> : vector<8x16xf32>
    %23 = tpu.matmul %22, %6, %cst_8 {dimension_numbers = #tpu.dot_dimension_numbers<[1], [0], [0], [1], [0, 0, 1, 1], [], []>} : vector<8x8xbf16>, vector<8x16xbf16>, vector<8x16xf32> -> vector<8x16xf32>
    %24 = vector.extract_strided_slice %1 {offsets = [0, 16], sizes = [8, 16], strides = [1, 1]} : vector<8x96xbf16> to vector<8x16xbf16>
    %25 = vector.extract_strided_slice %1 {offsets = [0, 48], sizes = [8, 16], strides = [1, 1]} : vector<8x96xbf16> to vector<8x16xbf16>
    %26 = vector.extract_strided_slice %1 {offsets = [0, 80], sizes = [8, 16], strides = [1, 1]} : vector<8x96xbf16> to vector<8x16xbf16>
    %cst_9 = arith.constant dense<0.000000e+00> : vector<8x8xf32>
    %27 = tpu.matmul %24, %25, %cst_9 {dimension_numbers = #tpu.dot_dimension_numbers<[1], [1], [0], [0], [0, 0, 1, 0], [], []>} : vector<8x16xbf16>, vector<8x16xbf16>, vector<8x8xf32> -> vector<8x8xf32>
    %cst_10 = arith.constant 2.500000e-01 : f32
    %28 = vector.broadcast %cst_10 : f32 to vector<8x8xf32>
    %29 = arith.mulf %27, %28 : vector<8x8xf32>
    %30 = vector.broadcast %3 : vector<1x8xf32> to vector<8x8xf32>
    %31 = arith.addf %29, %30 : vector<8x8xf32>
    %cst_11 = arith.constant dense<0xFF800000> : vector<8xf32>
    %32 = vector.multi_reduction <maximumf>, %31, %cst_11 [1] : vector<8x8xf32> to vector<8xf32>
    %33 = vector.shape_cast %32 : vector<8xf32> to vector<8x1xf32>
    %34 = vector.broadcast %33 : vector<8x1xf32> to vector<8x8xf32>
    %35 = arith.subf %31, %34 : vector<8x8xf32>
    %36 = math.exp %35 : vector<8x8xf32>
    %cst_12 = arith.constant dense<0.000000e+00> : vector<8xf32>
    %37 = vector.multi_reduction <add>, %36, %cst_12 [1] : vector<8x8xf32> to vector<8xf32>
    %38 = vector.shape_cast %37 : vector<8xf32> to vector<8x1xf32>
    %39 = tpu.reciprocal %38 {approx = true} : vector<8x1xf32> -> vector<8x1xf32>
    %40 = vector.broadcast %39 : vector<8x1xf32> to vector<8x8xf32>
    %41 = arith.mulf %36, %40 : vector<8x8xf32>
    %42 = arith.truncf %41 : vector<8x8xf32> to vector<8x8xbf16>
    %cst_13 = arith.constant dense<0.000000e+00> : vector<8x16xf32>
    %43 = tpu.matmul %42, %26, %cst_13 {dimension_numbers = #tpu.dot_dimension_numbers<[1], [0], [0], [1], [0, 0, 1, 1], [], []>} : vector<8x8xbf16>, vector<8x16xbf16>, vector<8x16xf32> -> vector<8x16xf32>
    %44 = tpu.concatenate %23, %43 in 1 : vector<8x16xf32>, vector<8x16xf32> -> vector<8x32xf32>
    %45 = arith.truncf %44 : vector<8x32xf32> to vector<8x32xbf16>
    %c0_14 = arith.constant 0 : index
    %c0_15 = arith.constant 0 : index
    %c0_16 = arith.constant 0 : index
    %46 = vector.load %arg3[%c0_14, %c0_15, %c0_16] : memref<1x8x32xbf16, #tpu.memory_space<vmem>>, vector<1x8x32xbf16>
    %47 = vector.shape_cast %46 : vector<1x8x32xbf16> to vector<8x32xbf16>
    %48 = vector.shape_cast %45 : vector<8x32xbf16> to vector<1x8x32xbf16>
    tpu.vector_store %arg3[%c0_14, %c0_15, %c0_16], %48 {strides = array<i32>} : memref<1x8x32xbf16, #tpu.memory_space<vmem>>, vector<1x8x32xbf16>,
    return
  }
  func.func @transform_0(%arg0: i32) -> (i32, i32, i32) {
    %c0_i32 = arith.constant 0 : i32
    %c0_i32_0 = arith.constant 0 : i32
    %c0_i32_1 = arith.constant 0 : i32
    return %arg0, %c0_i32, %c0_i32_0 : i32, i32, i32
  }
  func.func @transform_1(%arg0: i32) -> (i32, i32, i32) {
    %c0_i32 = arith.constant 0 : i32
    %c0_i32_0 = arith.constant 0 : i32
    %c0_i32_1 = arith.constant 0 : i32
    return %arg0, %c0_i32, %c0_i32_0 : i32, i32, i32
  }
  func.func @transform_2(%arg0: i32) -> (i32, i32, i32) {
    %c0_i32 = arith.constant 0 : i32
    %c0_i32_0 = arith.constant 0 : i32
    %c0_i32_1 = arith.constant 0 : i32
    return %arg0, %c0_i32, %c0_i32_0 : i32, i32, i32
  }
}

module attributes {stable_mosaic.version = 11 : i64} {
  func.func @_ln_kernel(%arg0: i32, %arg1: memref<16x32xf32, #tpu.memory_space<vmem>>, %arg2: memref<1x32xf32, #tpu.memory_space<vmem>>, %arg3: memref<1x32xf32, #tpu.memory_space<vmem>>, %arg4: memref<16x32xbf16, #tpu.memory_space<vmem>>) attributes {dimension_semantics = [#tpu.dimension_semantics<parallel>], iteration_bounds = array<i64: 1>, scalar_prefetch = 0 : i64, scratch_operands = 0 : i64, tpu.core_type = #tpu.core_type<tc>, window_params = [{transform_indices = @transform_0, window_bounds = array<i64: 16, 32>}, {pipeline_mode = #tpu.pipeline_mode<synchronous>, transform_indices = @transform_1, window_bounds = array<i64: 1, 32>}, {pipeline_mode = #tpu.pipeline_mode<synchronous>, transform_indices = @transform_2, window_bounds = array<i64: 1, 32>}, {transform_indices = @transform_3, window_bounds = array<i64: 16, 32>}]} {
    %c0 = arith.constant 0 : index
    %c0_0 = arith.constant 0 : index
    %0 = vector.load %arg1[%c0, %c0_0] : memref<16x32xf32, #tpu.memory_space<vmem>>, vector<16x32xf32>
    %cst = arith.constant dense<0.000000e+00> : vector<16xf32>
    %1 = vector.multi_reduction <add>, %0, %cst [1] : vector<16x32xf32> to vector<16xf32>
    %2 = vector.shape_cast %1 : vector<16xf32> to vector<16x1xf32>
    %cst_1 = arith.constant 3.200000e+01 : f32
    %3 = vector.broadcast %cst_1 : f32 to vector<16x1xf32>
    %4 = arith.divf %2, %3 : vector<16x1xf32>
    %5 = vector.broadcast %4 : vector<16x1xf32> to vector<16x32xf32>
    %6 = arith.subf %0, %5 : vector<16x32xf32>
    %7 = arith.mulf %6, %6 : vector<16x32xf32>
    %cst_2 = arith.constant dense<0.000000e+00> : vector<16xf32>
    %8 = vector.multi_reduction <add>, %7, %cst_2 [1] : vector<16x32xf32> to vector<16xf32>
    %9 = vector.shape_cast %8 : vector<16xf32> to vector<16x1xf32>
    %cst_3 = arith.constant 3.200000e+01 : f32
    %10 = vector.broadcast %cst_3 : f32 to vector<16x1xf32>
    %11 = arith.divf %9, %10 : vector<16x1xf32>
    %cst_4 = arith.constant 9.99999996E-13 : f32
    %12 = vector.broadcast %cst_4 : f32 to vector<16x1xf32>
    %13 = arith.addf %11, %12 : vector<16x1xf32>
    %14 = math.rsqrt %13 : vector<16x1xf32>
    %15 = vector.broadcast %14 : vector<16x1xf32> to vector<16x32xf32>
    %16 = arith.mulf %6, %15 : vector<16x32xf32>
    %c0_5 = arith.constant 0 : index
    %c0_6 = arith.constant 0 : index
    %17 = vector.load %arg2[%c0_5, %c0_6] : memref<1x32xf32, #tpu.memory_space<vmem>>, vector<1x32xf32>
    %18 = vector.broadcast %17 : vector<1x32xf32> to vector<16x32xf32>
    %19 = arith.mulf %16, %18 : vector<16x32xf32>
    %c0_7 = arith.constant 0 : index
    %c0_8 = arith.constant 0 : index
    %20 = vector.load %arg3[%c0_7, %c0_8] : memref<1x32xf32, #tpu.memory_space<vmem>>, vector<1x32xf32>
    %21 = vector.broadcast %20 : vector<1x32xf32> to vector<16x32xf32>
    %22 = arith.addf %19, %21 : vector<16x32xf32>
    %23 = arith.truncf %22 : vector<16x32xf32> to vector<16x32xbf16>
    %c0_9 = arith.constant 0 : index
    %c0_10 = arith.constant 0 : index
    %24 = vector.load %arg4[%c0_9, %c0_10] : memref<16x32xbf16, #tpu.memory_space<vmem>>, vector<16x32xbf16>
    tpu.vector_store %arg4[%c0_9, %c0_10], %23 {strides = array<i32>} : memref<16x32xbf16, #tpu.memory_space<vmem>>, vector<16x32xbf16>,
    return
  }
  func.func @transform_0(%arg0: i32) -> (i32, i32) {
    %c0_i32 = arith.constant 0 : i32
    %c0_i32_0 = arith.constant 0 : i32
    return %arg0, %c0_i32 : i32, i32
  }
  func.func @transform_1(%arg0: i32) -> (i32, i32) {
    %c0_i32 = arith.constant 0 : i32
    %c0_i32_0 = arith.constant 0 : i32
    %c0_i32_1 = arith.constant 0 : i32
    return %c0_i32, %c0_i32_0 : i32, i32
  }
  func.func @transform_2(%arg0: i32) -> (i32, i32) {
    %c0_i32 = arith.constant 0 : i32
    %c0_i32_0 = arith.constant 0 : i32
    %c0_i32_1 = arith.constant 0 : i32
    return %c0_i32, %c0_i32_0 : i32, i32
  }
  func.func @transform_3(%arg0: i32) -> (i32, i32) {
    %c0_i32 = arith.constant 0 : i32
    %c0_i32_0 = arith.constant 0 : i32
    return %arg0, %c0_i32 : i32, i32
  }
}

module attributes {stable_mosaic.version = 11 : i64} {
  func.func @_dense_kernel(%arg0: i32, %arg1: i32, %arg2: i32, %arg3: memref<16x32xbf16, #tpu.memory_space<vmem>>, %arg4: memref<32x96xbf16, #tpu.memory_space<vmem>>, %arg5: memref<1x96xf32, #tpu.memory_space<vmem>>, %arg6: memref<16x96xbf16, #tpu.memory_space<vmem>>, %arg7: memref<16x96xf32, #tpu.memory_space<vmem>>) attributes {dimension_semantics = [#tpu.dimension_semantics<parallel>, #tpu.dimension_semantics<parallel>, #tpu.dimension_semantics<arbitrary>], iteration_bounds = array<i64: 1, 1, 1>, scalar_prefetch = 0 : i64, scratch_operands = 1 : i64, tpu.core_type = #tpu.core_type<tc>, window_params = [{transform_indices = @transform_0, window_bounds = array<i64: 16, 32>}, {transform_indices = @transform_1, window_bounds = array<i64: 32, 96>}, {transform_indices = @transform_2, window_bounds = array<i64: 1, 96>}, {transform_indices = @transform_3, window_bounds = array<i64: 16, 96>}]} {
    %c0_i32 = arith.constant 0 : i32
    %0 = arith.cmpi eq, %arg2, %c0_i32 : i32
    %1 = arith.extui %0 : i1 to i32
    %c0_i32_0 = arith.constant 0 : i32
    %2 = arith.cmpi ne, %1, %c0_i32_0 : i32
    scf.if %2 {
      %cst_10 = arith.constant 0.000000e+00 : f32
      %12 = vector.broadcast %cst_10 : f32 to vector<16x96xf32>
      %c0_11 = arith.constant 0 : index
      %c0_12 = arith.constant 0 : index
      %13 = vector.load %arg7[%c0_11, %c0_12] : memref<16x96xf32, #tpu.memory_space<vmem>>, vector<16x96xf32>
      tpu.vector_store %arg7[%c0_11, %c0_12], %12 {strides = array<i32>} : memref<16x96xf32, #tpu.memory_space<vmem>>, vector<16x96xf32>,
    } else {
    }
    %c0 = arith.constant 0 : index
    %c0_1 = arith.constant 0 : index
    %3 = vector.load %arg7[%c0, %c0_1] : memref<16x96xf32, #tpu.memory_space<vmem>>, vector<16x96xf32>
    %c0_2 = arith.constant 0 : index
    %c0_3 = arith.constant 0 : index
    %4 = vector.load %arg3[%c0_2, %c0_3] : memref<16x32xbf16, #tpu.memory_space<vmem>>, vector<16x32xbf16>
    %c0_4 = arith.constant 0 : index
    %c0_5 = arith.constant 0 : index
    %5 = vector.load %arg4[%c0_4, %c0_5] : memref<32x96xbf16, #tpu.memory_space<vmem>>, vector<32x96xbf16>
    %cst = arith.constant dense<0.000000e+00> : vector<16x96xf32>
    %6 = tpu.matmul %4, %5, %cst {dimension_numbers = #tpu.dot_dimension_numbers<[1], [0], [0], [1], [0, 0, 1, 1], [], []>} : vector<16x32xbf16>, vector<32x96xbf16>, vector<16x96xf32> -> vector<16x96xf32>
    %7 = arith.addf %3, %6 : vector<16x96xf32>
    %c0_6 = arith.constant 0 : index
    %c0_7 = arith.constant 0 : index
    %8 = vector.load %arg7[%c0_6, %c0_7] : memref<16x96xf32, #tpu.memory_space<vmem>>, vector<16x96xf32>
    tpu.vector_store %arg7[%c0_6, %c0_7], %7 {strides = array<i32>} : memref<16x96xf32, #tpu.memory_space<vmem>>, vector<16x96xf32>,
    %c0_i32_8 = arith.constant 0 : i32
    %9 = arith.cmpi eq, %arg2, %c0_i32_8 : i32
    %10 = arith.extui %9 : i1 to i32
    %c0_i32_9 = arith.constant 0 : i32
    %11 = arith.cmpi ne, %10, %c0_i32_9 : i32
    scf.if %11 {
      %c0_10 = arith.constant 0 : index
      %c0_11 = arith.constant 0 : index
      %12 = vector.load %arg7[%c0_10, %c0_11] : memref<16x96xf32, #tpu.memory_space<vmem>>, vector<16x96xf32>
      %c0_12 = arith.constant 0 : index
      %c0_13 = arith.constant 0 : index
      %13 = vector.load %arg5[%c0_12, %c0_13] : memref<1x96xf32, #tpu.memory_space<vmem>>, vector<1x96xf32>
      %14 = vector.broadcast %13 : vector<1x96xf32> to vector<16x96xf32>
      %15 = arith.addf %12, %14 : vector<16x96xf32>
      %16 = arith.truncf %15 : vector<16x96xf32> to vector<16x96xbf16>
      %c0_14 = arith.constant 0 : index
      %c0_15 = arith.constant 0 : index
      %17 = vector.load %arg6[%c0_14, %c0_15] : memref<16x96xbf16, #tpu.memory_space<vmem>>, vector<16x96xbf16>
      tpu.vector_store %arg6[%c0_14, %c0_15], %16 {strides = array<i32>} : memref<16x96xbf16, #tpu.memory_space<vmem>>, vector<16x96xbf16>,
    } else {
    }
    return
  }
  func.func @transform_0(%arg0: i32, %arg1: i32, %arg2: i32) -> (i32, i32) {
    %c0_i32 = arith.constant 0 : i32
    return %arg0, %arg2 : i32, i32
  }
  func.func @transform_1(%arg0: i32, %arg1: i32, %arg2: i32) -> (i32, i32) {
    %c0_i32 = arith.constant 0 : i32
    return %arg2, %arg1 : i32, i32
  }
  func.func @transform_2(%arg0: i32, %arg1: i32, %arg2: i32) -> (i32, i32) {
    %c0_i32 = arith.constant 0 : i32
    %c0_i32_0 = arith.constant 0 : i32
    return %c0_i32, %arg1 : i32, i32
  }
  func.func @transform_3(%arg0: i32, %arg1: i32, %arg2: i32) -> (i32, i32) {
    %c0_i32 = arith.constant 0 : i32
    return %arg0, %arg1 : i32, i32
  }
}

module attributes {stable_mosaic.version = 11 : i64} {
  func.func @_dense_kernel(%arg0: i32, %arg1: i32, %arg2: i32, %arg3: memref<16x32xbf16, #tpu.memory_space<vmem>>, %arg4: memref<32x32xbf16, #tpu.memory_space<vmem>>, %arg5: memref<1x32xf32, #tpu.memory_space<vmem>>, %arg6: memref<16x32xbf16, #tpu.memory_space<vmem>>, %arg7: memref<1x32xf32, #tpu.memory_space<vmem>>, %arg8: memref<1x32xf32, #tpu.memory_space<vmem>>, %arg9: memref<16x32xbf16, #tpu.memory_space<vmem>>, %arg10: memref<16x32xf32, #tpu.memory_space<vmem>>) attributes {dimension_semantics = [#tpu.dimension_semantics<parallel>, #tpu.dimension_semantics<parallel>, #tpu.dimension_semantics<arbitrary>], iteration_bounds = array<i64: 1, 1, 1>, scalar_prefetch = 0 : i64, scratch_operands = 1 : i64, tpu.core_type = #tpu.core_type<tc>, window_params = [{transform_indices = @transform_0, window_bounds = array<i64: 16, 32>}, {transform_indices = @transform_1, window_bounds = array<i64: 32, 32>}, {transform_indices = @transform_2, window_bounds = array<i64: 1, 32>}, {transform_indices = @transform_3, window_bounds = array<i64: 16, 32>}, {transform_indices = @transform_4, window_bounds = array<i64: 1, 32>}, {transform_indices = @transform_5, window_bounds = array<i64: 1, 32>}, {transform_indices = @transform_6, window_bounds = array<i64: 16, 32>}]} {
    %c0_i32 = arith.constant 0 : i32
    %0 = arith.cmpi eq, %arg2, %c0_i32 : i32
    %1 = arith.extui %0 : i1 to i32
    %c0_i32_0 = arith.constant 0 : i32
    %2 = arith.cmpi ne, %1, %c0_i32_0 : i32
    scf.if %2 {
      %cst_10 = arith.constant 0.000000e+00 : f32
      %12 = vector.broadcast %cst_10 : f32 to vector<16x32xf32>
      %c0_11 = arith.constant 0 : index
      %c0_12 = arith.constant 0 : index
      %13 = vector.load %arg10[%c0_11, %c0_12] : memref<16x32xf32, #tpu.memory_space<vmem>>, vector<16x32xf32>
      tpu.vector_store %arg10[%c0_11, %c0_12], %12 {strides = array<i32>} : memref<16x32xf32, #tpu.memory_space<vmem>>, vector<16x32xf32>,
    } else {
    }
    %c0 = arith.constant 0 : index
    %c0_1 = arith.constant 0 : index
    %3 = vector.load %arg10[%c0, %c0_1] : memref<16x32xf32, #tpu.memory_space<vmem>>, vector<16x32xf32>
    %c0_2 = arith.constant 0 : index
    %c0_3 = arith.constant 0 : index
    %4 = vector.load %arg3[%c0_2, %c0_3] : memref<16x32xbf16, #tpu.memory_space<vmem>>, vector<16x32xbf16>
    %c0_4 = arith.constant 0 : index
    %c0_5 = arith.constant 0 : index
    %5 = vector.load %arg4[%c0_4, %c0_5] : memref<32x32xbf16, #tpu.memory_space<vmem>>, vector<32x32xbf16>
    %cst = arith.constant dense<0.000000e+00> : vector<16x32xf32>
    %6 = tpu.matmul %4, %5, %cst {dimension_numbers = #tpu.dot_dimension_numbers<[1], [0], [0], [1], [0, 0, 1, 1], [], []>} : vector<16x32xbf16>, vector<32x32xbf16>, vector<16x32xf32> -> vector<16x32xf32>
    %7 = arith.addf %3, %6 : vector<16x32xf32>
    %c0_6 = arith.constant 0 : index
    %c0_7 = arith.constant 0 : index
    %8 = vector.load %arg10[%c0_6, %c0_7] : memref<16x32xf32, #tpu.memory_space<vmem>>, vector<16x32xf32>
    tpu.vector_store %arg10[%c0_6, %c0_7], %7 {strides = array<i32>} : memref<16x32xf32, #tpu.memory_space<vmem>>, vector<16x32xf32>,
    %c0_i32_8 = arith.constant 0 : i32
    %9 = arith.cmpi eq, %arg2, %c0_i32_8 : i32
    %10 = arith.extui %9 : i1 to i32
    %c0_i32_9 = arith.constant 0 : i32
    %11 = arith.cmpi ne, %10, %c0_i32_9 : i32
    scf.if %11 {
      %c0_10 = arith.constant 0 : index
      %c0_11 = arith.constant 0 : index
      %12 = vector.load %arg10[%c0_10, %c0_11] : memref<16x32xf32, #tpu.memory_space<vmem>>, vector<16x32xf32>
      %c0_12 = arith.constant 0 : index
      %c0_13 = arith.constant 0 : index
      %13 = vector.load %arg5[%c0_12, %c0_13] : memref<1x32xf32, #tpu.memory_space<vmem>>, vector<1x32xf32>
      %14 = vector.broadcast %13 : vector<1x32xf32> to vector<16x32xf32>
      %15 = arith.addf %12, %14 : vector<16x32xf32>
      %c0_14 = arith.constant 0 : index
      %c0_15 = arith.constant 0 : index
      %16 = vector.load %arg6[%c0_14, %c0_15] : memref<16x32xbf16, #tpu.memory_space<vmem>>, vector<16x32xbf16>
      %17 = arith.extf %16 : vector<16x32xbf16> to vector<16x32xf32>
      %18 = arith.addf %15, %17 : vector<16x32xf32>
      %cst_16 = arith.constant dense<0.000000e+00> : vector<16xf32>
      %19 = vector.multi_reduction <add>, %18, %cst_16 [1] : vector<16x32xf32> to vector<16xf32>
      %20 = vector.shape_cast %19 : vector<16xf32> to vector<16x1xf32>
      %cst_17 = arith.constant 3.200000e+01 : f32
      %21 = vector.broadcast %cst_17 : f32 to vector<16x1xf32>
      %22 = arith.divf %20, %21 : vector<16x1xf32>
      %23 = vector.broadcast %22 : vector<16x1xf32> to vector<16x32xf32>
      %24 = arith.subf %18, %23 : vector<16x32xf32>
      %25 = arith.mulf %24, %24 : vector<16x32xf32>
      %cst_18 = arith.constant dense<0.000000e+00> : vector<16xf32>
      %26 = vector.multi_reduction <add>, %25, %cst_18 [1] : vector<16x32xf32> to vector<16xf32>
      %27 = vector.shape_cast %26 : vector<16xf32> to vector<16x1xf32>
      %cst_19 = arith.constant 3.200000e+01 : f32
      %28 = vector.broadcast %cst_19 : f32 to vector<16x1xf32>
      %29 = arith.divf %27, %28 : vector<16x1xf32>
      %cst_20 = arith.constant 9.99999996E-13 : f32
      %30 = vector.broadcast %cst_20 : f32 to vector<16x1xf32>
      %31 = arith.addf %29, %30 : vector<16x1xf32>
      %32 = math.rsqrt %31 : vector<16x1xf32>
      %33 = vector.broadcast %32 : vector<16x1xf32> to vector<16x32xf32>
      %34 = arith.mulf %24, %33 : vector<16x32xf32>
      %c0_21 = arith.constant 0 : index
      %c0_22 = arith.constant 0 : index
      %35 = vector.load %arg7[%c0_21, %c0_22] : memref<1x32xf32, #tpu.memory_space<vmem>>, vector<1x32xf32>
      %36 = vector.broadcast %35 : vector<1x32xf32> to vector<16x32xf32>
      %37 = arith.mulf %34, %36 : vector<16x32xf32>
      %c0_23 = arith.constant 0 : index
      %c0_24 = arith.constant 0 : index
      %38 = vector.load %arg8[%c0_23, %c0_24] : memref<1x32xf32, #tpu.memory_space<vmem>>, vector<1x32xf32>
      %39 = vector.broadcast %38 : vector<1x32xf32> to vector<16x32xf32>
      %40 = arith.addf %37, %39 : vector<16x32xf32>
      %41 = arith.truncf %40 : vector<16x32xf32> to vector<16x32xbf16>
      %c0_25 = arith.constant 0 : index
      %c0_26 = arith.constant 0 : index
      %42 = vector.load %arg9[%c0_25, %c0_26] : memref<16x32xbf16, #tpu.memory_space<vmem>>, vector<16x32xbf16>
      tpu.vector_store %arg9[%c0_25, %c0_26], %41 {strides = array<i32>} : memref<16x32xbf16, #tpu.memory_space<vmem>>, vector<16x32xbf16>,
    } else {
    }
    return
  }
  func.func @transform_0(%arg0: i32, %arg1: i32, %arg2: i32) -> (i32, i32) {
    %c0_i32 = arith.constant 0 : i32
    return %arg0, %arg2 : i32, i32
  }
  func.func @transform_1(%arg0: i32, %arg1: i32, %arg2: i32) -> (i32, i32) {
    %c0_i32 = arith.constant 0 : i32
    return %arg2, %arg1 : i32, i32
  }
  func.func @transform_2(%arg0: i32, %arg1: i32, %arg2: i32) -> (i32, i32) {
    %c0_i32 = arith.constant 0 : i32
    %c0_i32_0 = arith.constant 0 : i32
    return %c0_i32, %arg1 : i32, i32
  }
  func.func @transform_3(%arg0: i32, %arg1: i32, %arg2: i32) -> (i32, i32) {
    %c0_i32 = arith.constant 0 : i32
    return %arg0, %arg1 : i32, i32
  }
  func.func @transform_4(%arg0: i32, %arg1: i32, %arg2: i32) -> (i32, i32) {
    %c0_i32 = arith.constant 0 : i32
    %c0_i32_0 = arith.constant 0 : i32
    return %c0_i32, %arg1 : i32, i32
  }
  func.func @transform_5(%arg0: i32, %arg1: i32, %arg2: i32) -> (i32, i32) {
    %c0_i32 = arith.constant 0 : i32
    %c0_i32_0 = arith.constant 0 : i32
    return %c0_i32, %arg1 : i32, i32
  }
  func.func @transform_6(%arg0: i32, %arg1: i32, %arg2: i32) -> (i32, i32) {
    %c0_i32 = arith.constant 0 : i32
    return %arg0, %arg1 : i32, i32
  }
}

module attributes {stable_mosaic.version = 11 : i64} {
  func.func @_dense_kernel(%arg0: i32, %arg1: i32, %arg2: i32, %arg3: memref<16x32xbf16, #tpu.memory_space<vmem>>, %arg4: memref<32x64xbf16, #tpu.memory_space<vmem>>, %arg5: memref<1x64xf32, #tpu.memory_space<vmem>>, %arg6: memref<16x64xbf16, #tpu.memory_space<vmem>>, %arg7: memref<16x64xf32, #tpu.memory_space<vmem>>) attributes {dimension_semantics = [#tpu.dimension_semantics<parallel>, #tpu.dimension_semantics<parallel>, #tpu.dimension_semantics<arbitrary>], iteration_bounds = array<i64: 1, 1, 1>, scalar_prefetch = 0 : i64, scratch_operands = 1 : i64, tpu.core_type = #tpu.core_type<tc>, window_params = [{transform_indices = @transform_0, window_bounds = array<i64: 16, 32>}, {transform_indices = @transform_1, window_bounds = array<i64: 32, 64>}, {transform_indices = @transform_2, window_bounds = array<i64: 1, 64>}, {transform_indices = @transform_3, window_bounds = array<i64: 16, 64>}]} {
    %c0_i32 = arith.constant 0 : i32
    %0 = arith.cmpi eq, %arg2, %c0_i32 : i32
    %1 = arith.extui %0 : i1 to i32
    %c0_i32_0 = arith.constant 0 : i32
    %2 = arith.cmpi ne, %1, %c0_i32_0 : i32
    scf.if %2 {
      %cst_10 = arith.constant 0.000000e+00 : f32
      %12 = vector.broadcast %cst_10 : f32 to vector<16x64xf32>
      %c0_11 = arith.constant 0 : index
      %c0_12 = arith.constant 0 : index
      %13 = vector.load %arg7[%c0_11, %c0_12] : memref<16x64xf32, #tpu.memory_space<vmem>>, vector<16x64xf32>
      tpu.vector_store %arg7[%c0_11, %c0_12], %12 {strides = array<i32>} : memref<16x64xf32, #tpu.memory_space<vmem>>, vector<16x64xf32>,
    } else {
    }
    %c0 = arith.constant 0 : index
    %c0_1 = arith.constant 0 : index
    %3 = vector.load %arg7[%c0, %c0_1] : memref<16x64xf32, #tpu.memory_space<vmem>>, vector<16x64xf32>
    %c0_2 = arith.constant 0 : index
    %c0_3 = arith.constant 0 : index
    %4 = vector.load %arg3[%c0_2, %c0_3] : memref<16x32xbf16, #tpu.memory_space<vmem>>, vector<16x32xbf16>
    %c0_4 = arith.constant 0 : index
    %c0_5 = arith.constant 0 : index
    %5 = vector.load %arg4[%c0_4, %c0_5] : memref<32x64xbf16, #tpu.memory_space<vmem>>, vector<32x64xbf16>
    %cst = arith.constant dense<0.000000e+00> : vector<16x64xf32>
    %6 = tpu.matmul %4, %5, %cst {dimension_numbers = #tpu.dot_dimension_numbers<[1], [0], [0], [1], [0, 0, 1, 1], [], []>} : vector<16x32xbf16>, vector<32x64xbf16>, vector<16x64xf32> -> vector<16x64xf32>
    %7 = arith.addf %3, %6 : vector<16x64xf32>
    %c0_6 = arith.constant 0 : index
    %c0_7 = arith.constant 0 : index
    %8 = vector.load %arg7[%c0_6, %c0_7] : memref<16x64xf32, #tpu.memory_space<vmem>>, vector<16x64xf32>
    tpu.vector_store %arg7[%c0_6, %c0_7], %7 {strides = array<i32>} : memref<16x64xf32, #tpu.memory_space<vmem>>, vector<16x64xf32>,
    %c0_i32_8 = arith.constant 0 : i32
    %9 = arith.cmpi eq, %arg2, %c0_i32_8 : i32
    %10 = arith.extui %9 : i1 to i32
    %c0_i32_9 = arith.constant 0 : i32
    %11 = arith.cmpi ne, %10, %c0_i32_9 : i32
    scf.if %11 {
      %c0_10 = arith.constant 0 : index
      %c0_11 = arith.constant 0 : index
      %12 = vector.load %arg7[%c0_10, %c0_11] : memref<16x64xf32, #tpu.memory_space<vmem>>, vector<16x64xf32>
      %c0_12 = arith.constant 0 : index
      %c0_13 = arith.constant 0 : index
      %13 = vector.load %arg5[%c0_12, %c0_13] : memref<1x64xf32, #tpu.memory_space<vmem>>, vector<1x64xf32>
      %14 = vector.broadcast %13 : vector<1x64xf32> to vector<16x64xf32>
      %15 = arith.addf %12, %14 : vector<16x64xf32>
      %cst_14 = arith.constant 5.000000e-01 : f32
      %16 = vector.broadcast %cst_14 : f32 to vector<16x64xf32>
      %17 = arith.mulf %16, %15 : vector<16x64xf32>
      %cst_15 = arith.constant 0.707106769 : f32
      %18 = vector.broadcast %cst_15 : f32 to vector<16x64xf32>
      %19 = arith.mulf %15, %18 : vector<16x64xf32>
      %20 = math.erf %19 : vector<16x64xf32>
      %cst_16 = arith.constant 1.000000e+00 : f32
      %21 = vector.broadcast %cst_16 : f32 to vector<16x64xf32>
      %22 = arith.addf %21, %20 : vector<16x64xf32>
      %23 = arith.mulf %17, %22 : vector<16x64xf32>
      %24 = arith.truncf %23 : vector<16x64xf32> to vector<16x64xbf16>
      %c0_17 = arith.constant 0 : index
      %c0_18 = arith.constant 0 : index
      %25 = vector.load %arg6[%c0_17, %c0_18] : memref<16x64xbf16, #tpu.memory_space<vmem>>, vector<16x64xbf16>
      tpu.vector_store %arg6[%c0_17, %c0_18], %24 {strides = array<i32>} : memref<16x64xbf16, #tpu.memory_space<vmem>>, vector<16x64xbf16>,
    } else {
    }
    return
  }
  func.func @transform_0(%arg0: i32, %arg1: i32, %arg2: i32) -> (i32, i32) {
    %c0_i32 = arith.constant 0 : i32
    return %arg0, %arg2 : i32, i32
  }
  func.func @transform_1(%arg0: i32, %arg1: i32, %arg2: i32) -> (i32, i32) {
    %c0_i32 = arith.constant 0 : i32
    return %arg2, %arg1 : i32, i32
  }
  func.func @transform_2(%arg0: i32, %arg1: i32, %arg2: i32) -> (i32, i32) {
    %c0_i32 = arith.constant 0 : i32
    %c0_i32_0 = arith.constant 0 : i32
    return %c0_i32, %arg1 : i32, i32
  }
  func.func @transform_3(%arg0: i32, %arg1: i32, %arg2: i32) -> (i32, i32) {
    %c0_i32 = arith.constant 0 : i32
    return %arg0, %arg1 : i32, i32
  }
}

module attributes {stable_mosaic.version = 11 : i64} {
  func.func @_dense_kernel(%arg0: i32, %arg1: i32, %arg2: i32, %arg3: memref<16x64xbf16, #tpu.memory_space<vmem>>, %arg4: memref<64x32xbf16, #tpu.memory_space<vmem>>, %arg5: memref<1x32xf32, #tpu.memory_space<vmem>>, %arg6: memref<16x32xbf16, #tpu.memory_space<vmem>>, %arg7: memref<1x32xf32, #tpu.memory_space<vmem>>, %arg8: memref<1x32xf32, #tpu.memory_space<vmem>>, %arg9: memref<16x32xbf16, #tpu.memory_space<vmem>>, %arg10: memref<16x32xf32, #tpu.memory_space<vmem>>) attributes {dimension_semantics = [#tpu.dimension_semantics<parallel>, #tpu.dimension_semantics<parallel>, #tpu.dimension_semantics<arbitrary>], iteration_bounds = array<i64: 1, 1, 1>, scalar_prefetch = 0 : i64, scratch_operands = 1 : i64, tpu.core_type = #tpu.core_type<tc>, window_params = [{transform_indices = @transform_0, window_bounds = array<i64: 16, 64>}, {transform_indices = @transform_1, window_bounds = array<i64: 64, 32>}, {transform_indices = @transform_2, window_bounds = array<i64: 1, 32>}, {transform_indices = @transform_3, window_bounds = array<i64: 16, 32>}, {transform_indices = @transform_4, window_bounds = array<i64: 1, 32>}, {transform_indices = @transform_5, window_bounds = array<i64: 1, 32>}, {transform_indices = @transform_6, window_bounds = array<i64: 16, 32>}]} {
    %c0_i32 = arith.constant 0 : i32
    %0 = arith.cmpi eq, %arg2, %c0_i32 : i32
    %1 = arith.extui %0 : i1 to i32
    %c0_i32_0 = arith.constant 0 : i32
    %2 = arith.cmpi ne, %1, %c0_i32_0 : i32
    scf.if %2 {
      %cst_10 = arith.constant 0.000000e+00 : f32
      %12 = vector.broadcast %cst_10 : f32 to vector<16x32xf32>
      %c0_11 = arith.constant 0 : index
      %c0_12 = arith.constant 0 : index
      %13 = vector.load %arg10[%c0_11, %c0_12] : memref<16x32xf32, #tpu.memory_space<vmem>>, vector<16x32xf32>
      tpu.vector_store %arg10[%c0_11, %c0_12], %12 {strides = array<i32>} : memref<16x32xf32, #tpu.memory_space<vmem>>, vector<16x32xf32>,
    } else {
    }
    %c0 = arith.constant 0 : index
    %c0_1 = arith.constant 0 : index
    %3 = vector.load %arg10[%c0, %c0_1] : memref<16x32xf32, #tpu.memory_space<vmem>>, vector<16x32xf32>
    %c0_2 = arith.constant 0 : index
    %c0_3 = arith.constant 0 : index
    %4 = vector.load %arg3[%c0_2, %c0_3] : memref<16x64xbf16, #tpu.memory_space<vmem>>, vector<16x64xbf16>
    %c0_4 = arith.constant 0 : index
    %c0_5 = arith.constant 0 : index
    %5 = vector.load %arg4[%c0_4, %c0_5] : memref<64x32xbf16, #tpu.memory_space<vmem>>, vector<64x32xbf16>
    %cst = arith.constant dense<0.000000e+00> : vector<16x32xf32>
    %6 = tpu.matmul %4, %5, %cst {dimension_numbers = #tpu.dot_dimension_numbers<[1], [0], [0], [1], [0, 0, 1, 1], [], []>} : vector<16x64xbf16>, vector<64x32xbf16>, vector<16x32xf32> -> vector<16x32xf32>
    %7 = arith.addf %3, %6 : vector<16x32xf32>
    %c0_6 = arith.constant 0 : index
    %c0_7 = arith.constant 0 : index
    %8 = vector.load %arg10[%c0_6, %c0_7] : memref<16x32xf32, #tpu.memory_space<vmem>>, vector<16x32xf32>
    tpu.vector_store %arg10[%c0_6, %c0_7], %7 {strides = array<i32>} : memref<16x32xf32, #tpu.memory_space<vmem>>, vector<16x32xf32>,
    %c0_i32_8 = arith.constant 0 : i32
    %9 = arith.cmpi eq, %arg2, %c0_i32_8 : i32
    %10 = arith.extui %9 : i1 to i32
    %c0_i32_9 = arith.constant 0 : i32
    %11 = arith.cmpi ne, %10, %c0_i32_9 : i32
    scf.if %11 {
      %c0_10 = arith.constant 0 : index
      %c0_11 = arith.constant 0 : index
      %12 = vector.load %arg10[%c0_10, %c0_11] : memref<16x32xf32, #tpu.memory_space<vmem>>, vector<16x32xf32>
      %c0_12 = arith.constant 0 : index
      %c0_13 = arith.constant 0 : index
      %13 = vector.load %arg5[%c0_12, %c0_13] : memref<1x32xf32, #tpu.memory_space<vmem>>, vector<1x32xf32>
      %14 = vector.broadcast %13 : vector<1x32xf32> to vector<16x32xf32>
      %15 = arith.addf %12, %14 : vector<16x32xf32>
      %c0_14 = arith.constant 0 : index
      %c0_15 = arith.constant 0 : index
      %16 = vector.load %arg6[%c0_14, %c0_15] : memref<16x32xbf16, #tpu.memory_space<vmem>>, vector<16x32xbf16>
      %17 = arith.extf %16 : vector<16x32xbf16> to vector<16x32xf32>
      %18 = arith.addf %15, %17 : vector<16x32xf32>
      %cst_16 = arith.constant dense<0.000000e+00> : vector<16xf32>
      %19 = vector.multi_reduction <add>, %18, %cst_16 [1] : vector<16x32xf32> to vector<16xf32>
      %20 = vector.shape_cast %19 : vector<16xf32> to vector<16x1xf32>
      %cst_17 = arith.constant 3.200000e+01 : f32
      %21 = vector.broadcast %cst_17 : f32 to vector<16x1xf32>
      %22 = arith.divf %20, %21 : vector<16x1xf32>
      %23 = vector.broadcast %22 : vector<16x1xf32> to vector<16x32xf32>
      %24 = arith.subf %18, %23 : vector<16x32xf32>
      %25 = arith.mulf %24, %24 : vector<16x32xf32>
      %cst_18 = arith.constant dense<0.000000e+00> : vector<16xf32>
      %26 = vector.multi_reduction <add>, %25, %cst_18 [1] : vector<16x32xf32> to vector<16xf32>
      %27 = vector.shape_cast %26 : vector<16xf32> to vector<16x1xf32>
      %cst_19 = arith.constant 3.200000e+01 : f32
      %28 = vector.broadcast %cst_19 : f32 to vector<16x1xf32>
      %29 = arith.divf %27, %28 : vector<16x1xf32>
      %cst_20 = arith.constant 9.99999996E-13 : f32
      %30 = vector.broadcast %cst_20 : f32 to vector<16x1xf32>
      %31 = arith.addf %29, %30 : vector<16x1xf32>
      %32 = math.rsqrt %31 : vector<16x1xf32>
      %33 = vector.broadcast %32 : vector<16x1xf32> to vector<16x32xf32>
      %34 = arith.mulf %24, %33 : vector<16x32xf32>
      %c0_21 = arith.constant 0 : index
      %c0_22 = arith.constant 0 : index
      %35 = vector.load %arg7[%c0_21, %c0_22] : memref<1x32xf32, #tpu.memory_space<vmem>>, vector<1x32xf32>
      %36 = vector.broadcast %35 : vector<1x32xf32> to vector<16x32xf32>
      %37 = arith.mulf %34, %36 : vector<16x32xf32>
      %c0_23 = arith.constant 0 : index
      %c0_24 = arith.constant 0 : index
      %38 = vector.load %arg8[%c0_23, %c0_24] : memref<1x32xf32, #tpu.memory_space<vmem>>, vector<1x32xf32>
      %39 = vector.broadcast %38 : vector<1x32xf32> to vector<16x32xf32>
      %40 = arith.addf %37, %39 : vector<16x32xf32>
      %41 = arith.truncf %40 : vector<16x32xf32> to vector<16x32xbf16>
      %c0_25 = arith.constant 0 : index
      %c0_26 = arith.constant 0 : index
      %42 = vector.load %arg9[%c0_25, %c0_26] : memref<16x32xbf16, #tpu.memory_space<vmem>>, vector<16x32xbf16>
      tpu.vector_store %arg9[%c0_25, %c0_26], %41 {strides = array<i32>} : memref<16x32xbf16, #tpu.memory_space<vmem>>, vector<16x32xbf16>,
    } else {
    }
    return
  }
  func.func @transform_0(%arg0: i32, %arg1: i32, %arg2: i32) -> (i32, i32) {
    %c0_i32 = arith.constant 0 : i32
    return %arg0, %arg2 : i32, i32
  }
  func.func @transform_1(%arg0: i32, %arg1: i32, %arg2: i32) -> (i32, i32) {
    %c0_i32 = arith.constant 0 : i32
    return %arg2, %arg1 : i32, i32
  }
  func.func @transform_2(%arg0: i32, %arg1: i32, %arg2: i32) -> (i32, i32) {
    %c0_i32 = arith.constant 0 : i32
    %c0_i32_0 = arith.constant 0 : i32
    return %c0_i32, %arg1 : i32, i32
  }
  func.func @transform_3(%arg0: i32, %arg1: i32, %arg2: i32) -> (i32, i32) {
    %c0_i32 = arith.constant 0 : i32
    return %arg0, %arg1 : i32, i32
  }
  func.func @transform_4(%arg0: i32, %arg1: i32, %arg2: i32) -> (i32, i32) {
    %c0_i32 = arith.constant 0 : i32
    %c0_i32_0 = arith.constant 0 : i32
    return %c0_i32, %arg1 : i32, i32
  }
  func.func @transform_5(%arg0: i32, %arg1: i32, %arg2: i32) -> (i32, i32) {
    %c0_i32 = arith.constant 0 : i32
    %c0_i32_0 = arith.constant 0 : i32
    return %c0_i32, %arg1 : i32, i32
  }
  func.func @transform_6(%arg0: i32, %arg1: i32, %arg2: i32) -> (i32, i32) {
    %c0_i32 = arith.constant 0 : i32
    return %arg0, %arg1 : i32, i32
  }
}

module attributes {stable_mosaic.version = 11 : i64} {
  func.func @_dense_kernel(%arg0: i32, %arg1: i32, %arg2: i32, %arg3: memref<16x32xbf16, #tpu.memory_space<vmem>>, %arg4: memref<32x32xbf16, #tpu.memory_space<vmem>>, %arg5: memref<1x32xf32, #tpu.memory_space<vmem>>, %arg6: memref<16x32xbf16, #tpu.memory_space<vmem>>, %arg7: memref<16x32xf32, #tpu.memory_space<vmem>>) attributes {dimension_semantics = [#tpu.dimension_semantics<parallel>, #tpu.dimension_semantics<parallel>, #tpu.dimension_semantics<arbitrary>], iteration_bounds = array<i64: 1, 1, 1>, scalar_prefetch = 0 : i64, scratch_operands = 1 : i64, tpu.core_type = #tpu.core_type<tc>, window_params = [{transform_indices = @transform_0, window_bounds = array<i64: 16, 32>}, {transform_indices = @transform_1, window_bounds = array<i64: 32, 32>}, {transform_indices = @transform_2, window_bounds = array<i64: 1, 32>}, {transform_indices = @transform_3, window_bounds = array<i64: 16, 32>}]} {
    %c0_i32 = arith.constant 0 : i32
    %0 = arith.cmpi eq, %arg2, %c0_i32 : i32
    %1 = arith.extui %0 : i1 to i32
    %c0_i32_0 = arith.constant 0 : i32
    %2 = arith.cmpi ne, %1, %c0_i32_0 : i32
    scf.if %2 {
      %cst_10 = arith.constant 0.000000e+00 : f32
      %12 = vector.broadcast %cst_10 : f32 to vector<16x32xf32>
      %c0_11 = arith.constant 0 : index
      %c0_12 = arith.constant 0 : index
      %13 = vector.load %arg7[%c0_11, %c0_12] : memref<16x32xf32, #tpu.memory_space<vmem>>, vector<16x32xf32>
      tpu.vector_store %arg7[%c0_11, %c0_12], %12 {strides = array<i32>} : memref<16x32xf32, #tpu.memory_space<vmem>>, vector<16x32xf32>,
    } else {
    }
    %c0 = arith.constant 0 : index
    %c0_1 = arith.constant 0 : index
    %3 = vector.load %arg7[%c0, %c0_1] : memref<16x32xf32, #tpu.memory_space<vmem>>, vector<16x32xf32>
    %c0_2 = arith.constant 0 : index
    %c0_3 = arith.constant 0 : index
    %4 = vector.load %arg3[%c0_2, %c0_3] : memref<16x32xbf16, #tpu.memory_space<vmem>>, vector<16x32xbf16>
    %c0_4 = arith.constant 0 : index
    %c0_5 = arith.constant 0 : index
    %5 = vector.load %arg4[%c0_4, %c0_5] : memref<32x32xbf16, #tpu.memory_space<vmem>>, vector<32x32xbf16>
    %cst = arith.constant dense<0.000000e+00> : vector<16x32xf32>
    %6 = tpu.matmul %4, %5, %cst {dimension_numbers = #tpu.dot_dimension_numbers<[1], [0], [0], [1], [0, 0, 1, 1], [], []>} : vector<16x32xbf16>, vector<32x32xbf16>, vector<16x32xf32> -> vector<16x32xf32>
    %7 = arith.addf %3, %6 : vector<16x32xf32>
    %c0_6 = arith.constant 0 : index
    %c0_7 = arith.constant 0 : index
    %8 = vector.load %arg7[%c0_6, %c0_7] : memref<16x32xf32, #tpu.memory_space<vmem>>, vector<16x32xf32>
    tpu.vector_store %arg7[%c0_6, %c0_7], %7 {strides = array<i32>} : memref<16x32xf32, #tpu.memory_space<vmem>>, vector<16x32xf32>,
    %c0_i32_8 = arith.constant 0 : i32
    %9 = arith.cmpi eq, %arg2, %c0_i32_8 : i32
    %10 = arith.extui %9 : i1 to i32
    %c0_i32_9 = arith.constant 0 : i32
    %11 = arith.cmpi ne, %10, %c0_i32_9 : i32
    scf.if %11 {
      %c0_10 = arith.constant 0 : index
      %c0_11 = arith.constant 0 : index
      %12 = vector.load %arg7[%c0_10, %c0_11] : memref<16x32xf32, #tpu.memory_space<vmem>>, vector<16x32xf32>
      %c0_12 = arith.constant 0 : index
      %c0_13 = arith.constant 0 : index
      %13 = vector.load %arg5[%c0_12, %c0_13] : memref<1x32xf32, #tpu.memory_space<vmem>>, vector<1x32xf32>
      %14 = vector.broadcast %13 : vector<1x32xf32> to vector<16x32xf32>
      %15 = arith.addf %12, %14 : vector<16x32xf32>
      %cst_14 = arith.constant 5.000000e-01 : f32
      %16 = vector.broadcast %cst_14 : f32 to vector<16x32xf32>
      %17 = arith.mulf %16, %15 : vector<16x32xf32>
      %cst_15 = arith.constant 0.707106769 : f32
      %18 = vector.broadcast %cst_15 : f32 to vector<16x32xf32>
      %19 = arith.mulf %15, %18 : vector<16x32xf32>
      %20 = math.erf %19 : vector<16x32xf32>
      %cst_16 = arith.constant 1.000000e+00 : f32
      %21 = vector.broadcast %cst_16 : f32 to vector<16x32xf32>
      %22 = arith.addf %21, %20 : vector<16x32xf32>
      %23 = arith.mulf %17, %22 : vector<16x32xf32>
      %24 = arith.truncf %23 : vector<16x32xf32> to vector<16x32xbf16>
      %c0_17 = arith.constant 0 : index
      %c0_18 = arith.constant 0 : index
      %25 = vector.load %arg6[%c0_17, %c0_18] : memref<16x32xbf16, #tpu.memory_space<vmem>>, vector<16x32xbf16>
      tpu.vector_store %arg6[%c0_17, %c0_18], %24 {strides = array<i32>} : memref<16x32xbf16, #tpu.memory_space<vmem>>, vector<16x32xbf16>,
    } else {
    }
    return
  }
  func.func @transform_0(%arg0: i32, %arg1: i32, %arg2: i32) -> (i32, i32) {
    %c0_i32 = arith.constant 0 : i32
    return %arg0, %arg2 : i32, i32
  }
  func.func @transform_1(%arg0: i32, %arg1: i32, %arg2: i32) -> (i32, i32) {
    %c0_i32 = arith.constant 0 : i32
    return %arg2, %arg1 : i32, i32
  }
  func.func @transform_2(%arg0: i32, %arg1: i32, %arg2: i32) -> (i32, i32) {
    %c0_i32 = arith.constant 0 : i32
    %c0_i32_0 = arith.constant 0 : i32
    return %c0_i32, %arg1 : i32, i32
  }
  func.func @transform_3(%arg0: i32, %arg1: i32, %arg2: i32) -> (i32, i32) {
    %c0_i32 = arith.constant 0 : i32
    return %arg0, %arg1 : i32, i32
  }
}

module attributes {stable_mosaic.version = 11 : i64} {
  func.func @_dense_kernel(%arg0: i32, %arg1: i32, %arg2: i32, %arg3: memref<16x32xbf16, #tpu.memory_space<vmem>>, %arg4: memref<32x128xbf16, #tpu.memory_space<vmem>>, %arg5: memref<1x128xf32, #tpu.memory_space<vmem>>, %arg6: memref<16x128xf32, #tpu.memory_space<vmem>>, %arg7: memref<16x128xf32, #tpu.memory_space<vmem>>) attributes {dimension_semantics = [#tpu.dimension_semantics<parallel>, #tpu.dimension_semantics<parallel>, #tpu.dimension_semantics<arbitrary>], iteration_bounds = array<i64: 1, 1, 1>, scalar_prefetch = 0 : i64, scratch_operands = 1 : i64, tpu.core_type = #tpu.core_type<tc>, window_params = [{transform_indices = @transform_0, window_bounds = array<i64: 16, 32>}, {transform_indices = @transform_1, window_bounds = array<i64: 32, 128>}, {transform_indices = @transform_2, window_bounds = array<i64: 1, 128>}, {transform_indices = @transform_3, window_bounds = array<i64: 16, 128>}]} {
    %c0_i32 = arith.constant 0 : i32
    %0 = arith.cmpi eq, %arg2, %c0_i32 : i32
    %1 = arith.extui %0 : i1 to i32
    %c0_i32_0 = arith.constant 0 : i32
    %2 = arith.cmpi ne, %1, %c0_i32_0 : i32
    scf.if %2 {
      %cst_10 = arith.constant 0.000000e+00 : f32
      %12 = vector.broadcast %cst_10 : f32 to vector<16x128xf32>
      %c0_11 = arith.constant 0 : index
      %c0_12 = arith.constant 0 : index
      %13 = vector.load %arg7[%c0_11, %c0_12] : memref<16x128xf32, #tpu.memory_space<vmem>>, vector<16x128xf32>
      tpu.vector_store %arg7[%c0_11, %c0_12], %12 {strides = array<i32>} : memref<16x128xf32, #tpu.memory_space<vmem>>, vector<16x128xf32>,
    } else {
    }
    %c0 = arith.constant 0 : index
    %c0_1 = arith.constant 0 : index
    %3 = vector.load %arg7[%c0, %c0_1] : memref<16x128xf32, #tpu.memory_space<vmem>>, vector<16x128xf32>
    %c0_2 = arith.constant 0 : index
    %c0_3 = arith.constant 0 : index
    %4 = vector.load %arg3[%c0_2, %c0_3] : memref<16x32xbf16, #tpu.memory_space<vmem>>, vector<16x32xbf16>
    %c0_4 = arith.constant 0 : index
    %c0_5 = arith.constant 0 : index
    %5 = vector.load %arg4[%c0_4, %c0_5] : memref<32x128xbf16, #tpu.memory_space<vmem>>, vector<32x128xbf16>
    %cst = arith.constant dense<0.000000e+00> : vector<16x128xf32>
    %6 = tpu.matmul %4, %5, %cst {dimension_numbers = #tpu.dot_dimension_numbers<[1], [0], [0], [1], [0, 0, 1, 1], [], []>} : vector<16x32xbf16>, vector<32x128xbf16>, vector<16x128xf32> -> vector<16x128xf32>
    %7 = arith.addf %3, %6 : vector<16x128xf32>
    %c0_6 = arith.constant 0 : index
    %c0_7 = arith.constant 0 : index
    %8 = vector.load %arg7[%c0_6, %c0_7] : memref<16x128xf32, #tpu.memory_space<vmem>>, vector<16x128xf32>
    tpu.vector_store %arg7[%c0_6, %c0_7], %7 {strides = array<i32>} : memref<16x128xf32, #tpu.memory_space<vmem>>, vector<16x128xf32>,
    %c0_i32_8 = arith.constant 0 : i32
    %9 = arith.cmpi eq, %arg2, %c0_i32_8 : i32
    %10 = arith.extui %9 : i1 to i32
    %c0_i32_9 = arith.constant 0 : i32
    %11 = arith.cmpi ne, %10, %c0_i32_9 : i32
    scf.if %11 {
      %c0_10 = arith.constant 0 : index
      %c0_11 = arith.constant 0 : index
      %12 = vector.load %arg7[%c0_10, %c0_11] : memref<16x128xf32, #tpu.memory_space<vmem>>, vector<16x128xf32>
      %c0_12 = arith.constant 0 : index
      %c0_13 = arith.constant 0 : index
      %13 = vector.load %arg5[%c0_12, %c0_13] : memref<1x128xf32, #tpu.memory_space<vmem>>, vector<1x128xf32>
      %14 = vector.broadcast %13 : vector<1x128xf32> to vector<16x128xf32>
      %15 = arith.addf %12, %14 : vector<16x128xf32>
      %c0_14 = arith.constant 0 : index
      %c0_15 = arith.constant 0 : index
      %16 = vector.load %arg6[%c0_14, %c0_15] : memref<16x128xf32, #tpu.memory_space<vmem>>, vector<16x128xf32>
      tpu.vector_store %arg6[%c0_14, %c0_15], %15 {strides = array<i32>} : memref<16x128xf32, #tpu.memory_space<vmem>>, vector<16x128xf32>,
    } else {
    }
    return
  }
  func.func @transform_0(%arg0: i32, %arg1: i32, %arg2: i32) -> (i32, i32) {
    %c0_i32 = arith.constant 0 : i32
    return %arg0, %arg2 : i32, i32
  }
  func.func @transform_1(%arg0: i32, %arg1: i32, %arg2: i32) -> (i32, i32) {
    %c0_i32 = arith.constant 0 : i32
    return %arg2, %arg1 : i32, i32
  }
  func.func @transform_2(%arg0: i32, %arg1: i32, %arg2: i32) -> (i32, i32) {
    %c0_i32 = arith.constant 0 : i32
    %c0_i32_0 = arith.constant 0 : i32
    return %c0_i32, %arg1 : i32, i32
  }
  func.func @transform_3(%arg0: i32, %arg1: i32, %arg2: i32) -> (i32, i32) {
    %c0_i32 = arith.constant 0 : i32
    return %arg0, %arg1 : i32, i32
  }
}

</mosaic_0001>

<bundles_post_ra>
// kernel: bert_classifier_forward.15
= control target key start
LH: loop header
LB: loop body
LE: loop exit
PB: predicated region body
PF: predicated region fallthrough
CT: control target
= control target key end

     0   :  { %s563_s9 = smov 0   ;;  %s615_s0 = inlined_call_operand.vmem [shape: bf16[2,8,96], index: 0, kind: input, shape index: {}]   ;;  %s616_s1 = inlined_call_operand.vmem [shape: f32[2,1,8], index: 1, kind: input, shape index: {}]   ;;  %s617_s2 = inlined_call_operand.vmem [shape: bf16[2,8,32], index: 2, kind: output, shape index: {}]  }
   0x1 LB: > { %s460_s10 = sadd.s32 4294967295, %s538_s9   ;;  %p464_p0 = scmp.ge.s32.totalorder %s538_s9, 1  ;;  %s538_s9 = sphi %s563_s9, %s12_s9  }
   0x2   : > { %p119_p1 = scmp.lt.s32.totalorder %s538_s9, 3 }
   0x4   : > { %p120_p2 = pnand %p464_p0, %p119_p1 }
   0x5   : > { %p142_p3 = scmp.lt.s32.totalorder (!%p120_p2), %s460_s10, 1  ;;  %s542_s15 = smov (!%p120_p2), 96  }
   0x6   : > { %123 = sbr.rel (%p120_p2) target bundleno = 1482 (0x5ca), region = 28  ;;  %s543_s16 = smov (!%p120_p2), 64  }
   0x7   : > { %s544_s20 = smov (!%p120_p2), 80   ;;  %s545_s21 = smov (!%p120_p2), 112  }
   0x8   : > { %s546_s22 = smov (!%p120_p2), 48   ;;  %s547_s23 = smov (!%p120_p2), 16  }
   0xb   : > { %v540_v0 = vmov 0.0   ;;  %vm541_vm0 = vmmov 0   ;;  %s619_s10 = smov (!%p142_p3, %s460_s10), 1  ;;  %vm161_vm1 = vcmask 130048   ;;  %vm216_vm2 = vcmask 64512  }
   0xc   : > { %483 = vmatprep.subr.bf16.mxu0 %v540_v0  ;;  %485 = vmatprep.mubr.msk.bf16.mxu0 %vm541_vm0, %v540_v0  ;;  %s465_s11 = sshll.u32 %s619_s10, 2  ;;  %s148_s19 = scalar_lea.vmem %s616_s1, %s619_s10  ;;  %vm234_vm3 = vcmask 1043456   ;;  %vm396_vm4 = vcmask 257024  }
   0xd   : > { %489 = vmatprep.subr.bf16.mxu1 %v540_v0  ;;  %491 = vmatprep.mubr.msk.bf16.mxu1 %vm541_vm0, %v540_v0  ;;  %s145_s14 = scalar_lea.vmem %s615_s0, %s465_s11  ;;  %v469_v6 = vld [vmem:[%s148_s19] ss:$0 sm:$0xff]  ;;  %s152_s26 = scalar_lea.vmem %s617_s2, %s465_s11 }
   0xe   : > { %v154_v1 = vld [vmem:[%s145_s14] sm:$0xf] }
   0xf   : > { %v581_v2 = vcombine.low %v154_v1, %v154_v1 }
  0x11   : > { %159 = vrot.lane.b32.xlu0 %v581_v2, %s542_s15  ;;  %229 = vrot.lane.b32.xlu1 %v581_v2, %s543_s16 }
  0x83   : > { %v160_v3 = vpop.permute.xlu0 %159  ;;  %v230_v13 = vpop.permute.xlu1 %229 }
  0x84   : > { %v166_v4 = vsel %vm161_vm1, %v160_v3, 0  ;;  %v236_v14 = vsel %vm234_vm3, %v230_v13, 0 }
  0x85   : > { %484 = vmatpush3.bf16.xpose.msra.mxu0 %v166_v4  ;;  %490 = vmatpush3.bf16.msra.mxu1 %v236_v14 }
  0x86   : > { %501 = vmatprep.subr.bf16.mxu0 %v540_v0  ;;  %495 = vmatprep.subr.bf16.mxu1 %v540_v0 }
  0x8c   : > { %486 = vmatmul.mubr.msk.bf16.vlgmr.msra.gmra.mxu0 %vm161_vm1, %v154_v1 }
  0x8d   : > { %503 = vmatprep.mubr.msk.bf16.mxu0 %vm541_vm0, %v540_v0 }
 0x14c   : > { %v202_v5 = vpop.f32.mrf.mxu0 }
 0x14d   : > { %v208_v7 = vmul.f32 0.25, %v202_v5 }
 0x14e   : > { %v487_v8 = vpop.f32.mrf.mxu0 }
 0x14f   : > { %v215_v9 = vadd.f32 %v469_v6, %v208_v7 }
 0x150   : > { %v205_v10 = vpop.f32.mrf.mxu0 }
 0x151   : > { %v217_v11 = vsel %vm216_vm2, %v215_v9, -inf }
 0x152   : > { %218 = vmax.xlane.f32.xlu0 %v217_v11  ;;  %v488_v12 = vpop.f32.mrf.mxu0 }
 0x1db   : > { %v219_v15 = vpop.xlane.xlu0 %218 }
 0x1dc   : > { %v220_v16 = vsub.f32 %v215_v9, %v219_v15 }
 0x1de   : > { %v221_v17 = vmul.f32 1.442695, %v220_v16 }
 0x1e0   : > { %524 = vpow2.f32 %v221_v17 }
 0x1ed   : > { %v525_v18 = vpop.eup %524 }
 0x1ee   : > { %v223_v19 = vsel %vm216_vm2, %v525_v18, 0.0 }
 0x1ef   : > { %224 = vadd.xlane.f32.xlu1 %v223_v19 }
 0x200   : > { %280 = vrot.lane.b32.xlu1 %v581_v2, %s544_s20 }
 0x204   : > { %278 = vrot.lane.b32.xlu1 %v581_v2, %s545_s21 }
 0x278   : > { %v225_v20 = vpop.xlane.xlu1 %224 }
 0x279   : > { %526 = vrcp.f32 %v225_v20 }
 0x27c   : > { %v281_v22 = vpop.permute.xlu1 %280 }
 0x27d   : > { %v286_v24 = vsel %vm161_vm1, %v281_v22, 0 }
 0x280   : > { %v279_v26 = vpop.permute.xlu1 %278 }
 0x286   : > { %v527_v21 = vpop.eup %526 }
 0x287   : > { %v227_v23 = vmul.f32 %v527_v21, %v525_v18 }
 0x289   : > { %v228_v25 = vpack.c.bf16 %v227_v23, %v227_v23 }
 0x28b   : > { %492 = vmatmul.mubr.msk.bf16.vlgmr.msra.gmra.mxu1 %vm216_vm2, %v228_v25 }
 0x28c   : > { %496 = vmatpush3.bf16.xpose.msra.mxu1 %v286_v24  ;;  %497 = vmatprep.mubr.msk.bf16.mxu1 %vm541_vm0, %v540_v0 }
 0x293   : > { %498 = vmatmul.mubr.msk.bf16.vlgmr.msra.gmra.mxu1 %vm161_vm1, %v279_v26 }
 0x34b   : > { %v272_v27 = vpop.f32.mrf.mxu1 }
 0x34d   : > { %v493_v28 = vpop.f32.mrf.mxu1 }
 0x34f   : > { %v275_v29 = vpop.f32.mrf.mxu1 }
 0x351   : > { %v494_v30 = vpop.f32.mrf.mxu1 }
 0x353   : > { %v322_v31 = vpop.f32.mrf.mxu1 }
 0x354   : > { %v328_v32 = vmul.f32 0.25, %v322_v31 }
 0x355   : > { %v499_v33 = vpop.f32.mrf.mxu1 }
 0x356   : > { %v329_v34 = vadd.f32 %v469_v6, %v328_v32 }
 0x357   : > { %v325_v35 = vpop.f32.mrf.mxu1 }
 0x358   : > { %v330_v36 = vsel %vm216_vm2, %v329_v34, -inf }
 0x359   : > { %331 = vmax.xlane.f32.xlu1 %v330_v36  ;;  %v500_v37 = vpop.f32.mrf.mxu1 }
 0x3e2   : > { %v332_v38 = vpop.xlane.xlu1 %331 }
 0x3e3   : > { %v333_v39 = vsub.f32 %v329_v34, %v332_v38 }
 0x3e5   : > { %v334_v40 = vmul.f32 1.442695, %v333_v39 }
 0x3e7   : > { %528 = vpow2.f32 %v334_v40 }
 0x3f4   : > { %v529_v41 = vpop.eup %528 }
 0x3f5   : > { %v336_v42 = vsel %vm216_vm2, %v529_v41, 0.0 }
 0x3f6   : > { %337 = vadd.xlane.f32.xlu0 %v336_v42 }
 0x40c   : > { %342 = vrot.lane.b32.xlu0 %v581_v2, %s546_s22 }
 0x47f   : > { %v338_v43 = vpop.xlane.xlu0 %337 }
 0x480   : > { %530 = vrcp.f32 %v338_v43 }
 0x483   : > { %v343_v44 = vpop.permute.xlu0 %342 }
 0x484   : > { %v348_v45 = vsel %vm234_vm3, %v343_v44, 0 }
 0x485   : > { %502 = vmatpush3.bf16.msra.mxu0 %v348_v45 }
 0x48d   : > { %v531_v46 = vpop.eup %530 }
 0x48e   : > { %v340_v47 = vmul.f32 %v531_v46, %v529_v41 }
 0x490   : > { %v341_v48 = vpack.c.bf16 %v340_v47, %v340_v47 }
 0x492   : > { %504 = vmatmul.mubr.msk.bf16.vlgmr.msra.gmra.mxu0 %vm216_vm2, %v341_v48 }
 0x552   : > { %v384_v49 = vpop.f32.mrf.mxu0 }
 0x553   : > { %391 = vrot.lane.b32.xlu0 %v384_v49, %s547_s23 }
 0x554   : > { %v505_v50 = vpop.f32.mrf.mxu0 }
 0x556   : > { %v387_v51 = vpop.f32.mrf.mxu0 }
 0x558   : > { %v506_v52 = vpop.f32.mrf.mxu0 }
 0x5c5   : > { %v392_v53 = vpop.permute.xlu0 %391 }
 0x5c6   : > { %v394_v54 = vsel %vm161_vm1, %v272_v27, %v392_v53 }
 0x5c7   : > { %v395_v55 = vpack.c.bf16 %v394_v54, %v394_v54 }
 0x5c9   : > { %397 = vst.msk [vmem:[%s152_s26] sm:$0xf] %vm396_vm4, %v395_v55 }
 0x5ca PF: > { %s12_s9 = sadd.s32 1, %s538_s9  }
 0x5cb   : > { %p9_p4 = scmp.ge.s32.totalorder %s12_s9, 4  }
 0x5cd   :  { %11 = sbr.rel (!%p9_p4) target bundleno = 1 (0x1), region = 61 }

// kernel: bert_classifier_forward.13
= control target key start
LH: loop header
LB: loop body
LE: loop exit
PB: predicated region body
PF: predicated region fallthrough
CT: control target
= control target key end

     0   :  { %vm16_vm0 = vcmask 261120   ;;  %vm70_vm1 = vcmask 257024   ;;  %s129_s0 = inlined_call_operand.vmem [shape: f32[16,32], index: 0, kind: input, shape index: {}]   ;;  %s130_s1 = inlined_call_operand.vmem [shape: f32[1,32], index: 1, kind: input, shape index: {}]   ;;  %s131_s2 = inlined_call_operand.vmem [shape: f32[1,32], index: 2, kind: input, shape index: {}]   ;;  %s132_s3 = inlined_call_operand.vmem [shape: bf16[16,32], index: 3, kind: output, shape index: {}]  }
   0x1   :  { %v14_v0 = vld [vmem:[%s129_s0] sm:$0xff]  ;;  %v15_v1 = vld [vmem:[%s129_s0 + $0x8] sm:$0xff] }
   0x2   :  { %v17_v2 = vsel %vm16_vm0, %v14_v0, 0.0  ;;  %v20_v3 = vsel %vm16_vm0, %v15_v1, 0.0  ;;  %v77_v21 = vld [vmem:[%s130_s1] ss:$0 sm:$0xff] }
   0x3   :  { %18 = vadd.xlane.f32.xlu0 %v17_v2  ;;  %v78_v23 = vld [vmem:[%s131_s2] ss:$0 sm:$0xff] }
   0x7   :  { %21 = vadd.xlane.f32.xlu0 %v20_v3 }
  0x8c   :  { %v19_v4 = vpop.xlane.xlu0 %18 }
  0x8d   :  { %v24_v5 = vmul.f32 0.03125, %v19_v4 }
  0x8f   :  { %v26_v6 = vsub.f32 %v14_v0, %v24_v5 }
  0x90   :  { %v22_v7 = vpop.xlane.xlu0 %21 }
  0x91   :  { %v25_v8 = vmul.f32 0.03125, %v22_v7  ;;  %v28_v9 = vmul.f32 %v26_v6, %v26_v6 }
  0x93   :  { %v27_v10 = vsub.f32 %v15_v1, %v25_v8  ;;  %v30_v11 = vsel %vm16_vm0, %v28_v9, 0.0 }
  0x94   :  { %31 = vadd.xlane.f32.xlu1 %v30_v11 }
  0x95   :  { %v29_v12 = vmul.f32 %v27_v10, %v27_v10 }
  0x97   :  { %v33_v13 = vsel %vm16_vm0, %v29_v12, 0.0 }
  0x98   :  { %34 = vadd.xlane.f32.xlu1 %v33_v13 }
 0x11d   :  { %v32_v14 = vpop.xlane.xlu1 %31 }
 0x11e   :  { %v36_v15 = vmul.f32 0.03125, %v32_v14 }
 0x120   :  { %v38_v16 = vadd.f32 1e-12, %v36_v15 }
 0x121   :  { %v35_v17 = vpop.xlane.xlu1 %34 }
 0x122   :  { %83 = vrsqrt.f32 %v38_v16  ;;  %v37_v18 = vmul.f32 0.03125, %v35_v17 }
 0x124   :  { %v39_v19 = vadd.f32 1e-12, %v37_v18 }
 0x126   :  { %85 = vrsqrt.f32 %v39_v19 }
 0x12f   :  { %v84_v20 = vpop.eup %83 }
 0x130   :  { %v42_v22 = vmul.f32 %v84_v20, %v26_v6 }
 0x132   :  { %v51_v24 = vmul.f32 %v77_v21, %v42_v22 }
 0x133   :  { %v86_v25 = vpop.eup %85 }
 0x134   :  { %v60_v26 = vadd.f32 %v78_v23, %v51_v24  ;;  %v43_v27 = vmul.f32 %v86_v25, %v27_v10 }
 0x136   :  { %v81_v28 = vpack.c.bf16 %v60_v26, %v60_v26  ;;  %v52_v29 = vmul.f32 %v77_v21, %v43_v27 }
 0x138   :  { %71 = vst.msk [vmem:[%s132_s3] sm:$0xf] %vm70_vm1, %v81_v28  ;;  %v61_v30 = vadd.f32 %v78_v23, %v52_v29 }
 0x13a   :  { %v82_v31 = vpack.c.bf16 %v61_v30, %v61_v30 }
 0x13c   :  { %72 = vst.msk [vmem:[%s132_s3 + $0x4] sm:$0xf] %vm70_vm1, %v82_v31 }

// kernel: bert_classifier_forward.14
= control target key start
LH: loop header
LB: loop body
LE: loop exit
PB: predicated region body
PF: predicated region fallthrough
CT: control target
= control target key end

     0   :  { %vm19_vm0 = vcmask 785408   ;;  %v151_v0 = vmov 0.0   ;;  %vm152_vm1 = vmmov 0   ;;  %vm47_vm2 = vcmask 261120   ;;  %s195_s1 = inlined_call_operand.vmem [shape: bf16[32,96], index: 1, kind: input, shape index: {}]   ;;  %s196_s0 = inlined_call_operand.vmem [shape: bf16[16,32], index: 0, kind: input, shape index: {}]   ;;  %s197_s2 = inlined_call_operand.vmem [shape: f32[1,96], index: 2, kind: input, shape index: {}]   ;;  %s198_s3 = inlined_call_operand.vmem [shape: bf16[16,96], index: 3, kind: output, shape index: {}]  }
   0x1   :  { %138 = vmatprep.subr.bf16.mxu0 %v151_v0  ;;  %v148_v1 = vld [vmem:[%s195_s1 + $0x8] sm:$0xff]   ;;  %142 = vmatprep.mubr.msk.bf16.mxu0 %vm152_vm1, %v151_v0  ;;  %20 = vst.msk [vmem:[#allocation2] sm:$0xff] %vm19_vm0, %v151_v0  ;;  %21 = vst.msk [vmem:[#allocation2 + $0x8] sm:$0xff] %vm19_vm0, %v151_v0  ;;  %v149_v2 = vld [vmem:[%s195_s1] sm:$0xff]   ;;  %vm119_vm3 = vcmask 781312  }
   0x2   :  { %139 = vmatpush3.bf16.msra.mxu0 %v148_v1  ;;  %v150_v3 = vld [vmem:[%s196_s0] sm:$0xff]  }
   0x3   :  { %140 = vmatprep.subr.bf16.mxu0 %v151_v0  ;;  %v130_v12 = vld [vmem:[%s197_s2] ss:$0 sm:$0xff] }
   0x6   :  { %141 = vmatpush3.bf16.msra.mxu0 %v149_v2 }
   0x8   :  { %v22_v4 = vld [vmem:[#allocation2] sm:$0xff]  ;;  %v23_v8 = vld [vmem:[#allocation2 + $0x8] sm:$0xff] }
   0x9   :  { %143 = vmatmul.mubr.msk.bf16.vlgmr.msra.gmra.mxu0 %vm47_vm2, %v150_v3 }
  0xc9   :  { %v85_v5 = vpop.f32.mrf.mxu0 }
  0xca   :  { %v92_v6 = vadd.f32 %v85_v5, %v22_v4 }
  0xcb   :  { %v144_v7 = vpop.f32.mrf.mxu0 }
  0xcc   :  { %95 = vst.msk [vmem:[#allocation2] sm:$0xff] %vm19_vm0, %v92_v6 }
  0xcd   :  { %v88_v9 = vpop.f32.mrf.mxu0 }
  0xce   :  { %v93_v10 = vadd.f32 %v88_v9, %v23_v8 }
  0xcf   :  { %v145_v11 = vpop.f32.mrf.mxu0 }
  0xd0   :  { %96 = vst.msk [vmem:[#allocation2 + $0x8] sm:$0xff] %vm19_vm0, %v93_v10 }
  0xd3   :  { %v100_v13 = vld [vmem:[#allocation2] sm:$0xff] }
  0xd4   :  { %v109_v14 = vadd.f32 %v130_v12, %v100_v13 }
  0xd6   :  { %v133_v15 = vpack.c.bf16 %v109_v14, %v109_v14 }
  0xd7   :  { %v101_v16 = vld [vmem:[#allocation2 + $0x8] sm:$0xff] }
  0xd8   :  { %120 = vst.msk [vmem:[%s198_s3] sm:$0xf] %vm119_vm3, %v133_v15  ;;  %v110_v17 = vadd.f32 %v130_v12, %v101_v16 }
  0xda   :  { %v134_v18 = vpack.c.bf16 %v110_v17, %v110_v17 }
  0xdc   :  { %121 = vst.msk [vmem:[%s198_s3 + $0x4] sm:$0xf] %vm119_vm3, %v134_v18 }

// kernel: bert_classifier_forward.16
= control target key start
LH: loop header
LB: loop body
LE: loop exit
PB: predicated region body
PF: predicated region fallthrough
CT: control target
= control target key end

     0   :  { %vm28_vm0 = vcmask 261120   ;;  %v220_v0 = vmov 0.0   ;;  %vm221_vm1 = vmmov 0   ;;  %vm178_vm2 = vcmask 257024   ;;  %s293_s1 = inlined_call_operand.vmem [shape: bf16[32,32], index: 1, kind: input, shape index: {}]   ;;  %s294_s0 = inlined_call_operand.vmem [shape: bf16[16,32], index: 0, kind: input, shape index: {}]   ;;  %s295_s3 = inlined_call_operand.vmem [shape: bf16[16,32], index: 3, kind: input, shape index: {}]   ;;  %s296_s2 = inlined_call_operand.vmem [shape: f32[1,32], index: 2, kind: input, shape index: {}]   ;;  %s297_s4 = inlined_call_operand.vmem [shape: f32[1,32], index: 4, kind: input, shape index: {}]   ;;  %s298_s5 = inlined_call_operand.vmem [shape: f32[1,32], index: 5, kind: input, shape index: {}]   ;;  %s299_s6 = inlined_call_operand.vmem [shape: bf16[16,32], index: 6, kind: output, shape index: {}]  }
   0x1   :  { %203 = vmatprep.subr.bf16.mxu0 %v220_v0  ;;  %v213_v1 = vld [vmem:[%s293_s1 + $0x8] sm:$0xff]   ;;  %207 = vmatprep.mubr.msk.bf16.mxu0 %vm221_vm1, %v220_v0  ;;  %29 = vst.msk [vmem:[#allocation2] sm:$0xff] %vm28_vm0, %v220_v0  ;;  %30 = vst.msk [vmem:[#allocation2 + $0x8] sm:$0xff] %vm28_vm0, %v220_v0  ;;  %v214_v2 = vld [vmem:[%s293_s1] sm:$0xff]  }
   0x2   :  { %204 = vmatpush3.bf16.msra.mxu0 %v213_v1  ;;  %v215_v3 = vld [vmem:[%s294_s0] sm:$0xff]  }
   0x3   :  { %205 = vmatprep.subr.bf16.mxu0 %v220_v0  ;;  %v197_v12 = vld [vmem:[%s295_s3] sm:$0xff]  }
   0x4   :  { %v189_v13 = vld [vmem:[%s296_s2] ss:$0 sm:$0xff]  ;;  %v198_v14 = vunpack.c.l.bf16 %v197_v12  ;;  %v199_v18 = vunpack.c.h.bf16 %v197_v12 }
   0x5   :  { %v190_v41 = vld [vmem:[%s297_s4] ss:$0 sm:$0xff] }
   0x6   :  { %206 = vmatpush3.bf16.msra.mxu0 %v214_v2  ;;  %v191_v43 = vld [vmem:[%s298_s5] ss:$0 sm:$0xff] }
   0x8   :  { %v31_v4 = vld [vmem:[#allocation2] sm:$0xff]  ;;  %v32_v8 = vld [vmem:[#allocation2 + $0x8] sm:$0xff] }
   0x9   :  { %208 = vmatmul.mubr.msk.bf16.vlgmr.msra.gmra.mxu0 %vm28_vm0, %v215_v3 }
  0xc9   :  { %v94_v5 = vpop.f32.mrf.mxu0 }
  0xca   :  { %v101_v6 = vadd.f32 %v94_v5, %v31_v4 }
  0xcb   :  { %v209_v7 = vpop.f32.mrf.mxu0 }
  0xcc   :  { %103 = vst.msk [vmem:[#allocation2] sm:$0xff] %vm28_vm0, %v101_v6 }
  0xcd   :  { %v97_v9 = vpop.f32.mrf.mxu0 }
  0xce   :  { %v102_v10 = vadd.f32 %v97_v9, %v32_v8 }
  0xcf   :  { %v210_v11 = vpop.f32.mrf.mxu0 }
  0xd0   :  { %104 = vst.msk [vmem:[#allocation2 + $0x8] sm:$0xff] %vm28_vm0, %v102_v10 }
  0xd3   :  { %v108_v15 = vld [vmem:[#allocation2] sm:$0xff] }
  0xd4   :  { %v117_v16 = vadd.f32 %v189_v13, %v108_v15 }
  0xd6   :  { %v123_v17 = vadd.f32 %v198_v14, %v117_v16 }
  0xd7   :  { %v109_v19 = vld [vmem:[#allocation2 + $0x8] sm:$0xff] }
  0xd8   :  { %v125_v20 = vsel %vm28_vm0, %v123_v17, 0.0  ;;  %v118_v21 = vadd.f32 %v189_v13, %v109_v19 }
  0xd9   :  { %126 = vadd.xlane.f32.xlu0 %v125_v20 }
  0xda   :  { %v124_v22 = vadd.f32 %v199_v18, %v118_v21 }
  0xdc   :  { %v128_v23 = vsel %vm28_vm0, %v124_v22, 0.0 }
  0xdd   :  { %129 = vadd.xlane.f32.xlu0 %v128_v23 }
 0x162   :  { %v127_v24 = vpop.xlane.xlu0 %126 }
 0x163   :  { %v132_v25 = vmul.f32 0.03125, %v127_v24 }
 0x165   :  { %v134_v26 = vsub.f32 %v123_v17, %v132_v25 }
 0x166   :  { %v130_v27 = vpop.xlane.xlu0 %129 }
 0x167   :  { %v133_v28 = vmul.f32 0.03125, %v130_v27  ;;  %v136_v29 = vmul.f32 %v134_v26, %v134_v26 }
 0x169   :  { %v135_v30 = vsub.f32 %v124_v22, %v133_v28  ;;  %v138_v31 = vsel %vm28_vm0, %v136_v29, 0.0 }
 0x16a   :  { %139 = vadd.xlane.f32.xlu1 %v138_v31 }
 0x16b   :  { %v137_v32 = vmul.f32 %v135_v30, %v135_v30 }
 0x16d   :  { %v141_v33 = vsel %vm28_vm0, %v137_v32, 0.0 }
 0x16e   :  { %142 = vadd.xlane.f32.xlu1 %v141_v33 }
 0x1f3   :  { %v140_v34 = vpop.xlane.xlu1 %139 }
 0x1f4   :  { %v144_v35 = vmul.f32 0.03125, %v140_v34 }
 0x1f6   :  { %v146_v36 = vadd.f32 1e-12, %v144_v35 }
 0x1f7   :  { %v143_v37 = vpop.xlane.xlu1 %142 }
 0x1f8   :  { %216 = vrsqrt.f32 %v146_v36  ;;  %v145_v38 = vmul.f32 0.03125, %v143_v37 }
 0x1fa   :  { %v147_v39 = vadd.f32 1e-12, %v145_v38 }
 0x1fc   :  { %218 = vrsqrt.f32 %v147_v39 }
 0x205   :  { %v217_v40 = vpop.eup %216 }
 0x206   :  { %v150_v42 = vmul.f32 %v217_v40, %v134_v26 }
 0x208   :  { %v159_v44 = vmul.f32 %v190_v41, %v150_v42 }
 0x209   :  { %v219_v45 = vpop.eup %218 }
 0x20a   :  { %v168_v46 = vadd.f32 %v191_v43, %v159_v44  ;;  %v151_v47 = vmul.f32 %v219_v45, %v135_v30 }
 0x20c   :  { %v194_v48 = vpack.c.bf16 %v168_v46, %v168_v46  ;;  %v160_v49 = vmul.f32 %v190_v41, %v151_v47 }
 0x20e   :  { %179 = vst.msk [vmem:[%s299_s6] sm:$0xf] %vm178_vm2, %v194_v48  ;;  %v169_v50 = vadd.f32 %v191_v43, %v160_v49 }
 0x210   :  { %v195_v51 = vpack.c.bf16 %v169_v50, %v169_v50 }
 0x212   :  { %180 = vst.msk [vmem:[%s299_s6 + $0x4] sm:$0xf] %vm178_vm2, %v195_v51 }

// kernel: bert_classifier_forward.17
= control target key start
LH: loop header
LB: loop body
LE: loop exit
PB: predicated region body
PF: predicated region fallthrough
CT: control target
= control target key end

     0   :  { %vm19_vm0 = vcmask 523264   ;;  %v165_v0 = vmov 0.0   ;;  %vm166_vm1 = vmmov 0   ;;  %vm47_vm2 = vcmask 261120   ;;  %s209_s1 = inlined_call_operand.vmem [shape: bf16[32,64], index: 1, kind: input, shape index: {}]   ;;  %s210_s0 = inlined_call_operand.vmem [shape: bf16[16,32], index: 0, kind: input, shape index: {}]   ;;  %s211_s2 = inlined_call_operand.vmem [shape: f32[1,64], index: 2, kind: input, shape index: {}]   ;;  %s212_s3 = inlined_call_operand.vmem [shape: bf16[16,64], index: 3, kind: output, shape index: {}]  }
   0x1   :  { %148 = vmatprep.subr.bf16.mxu0 %v165_v0  ;;  %v158_v1 = vld [vmem:[%s209_s1 + $0x8] sm:$0xff]   ;;  %152 = vmatprep.mubr.msk.bf16.mxu0 %vm166_vm1, %v165_v0  ;;  %20 = vst.msk [vmem:[#allocation2] sm:$0xff] %vm19_vm0, %v165_v0  ;;  %21 = vst.msk [vmem:[#allocation2 + $0x8] sm:$0xff] %vm19_vm0, %v165_v0  ;;  %v159_v2 = vld [vmem:[%s209_s1] sm:$0xff]   ;;  %vm129_vm3 = vcmask 519168  }
   0x2   :  { %149 = vmatpush3.bf16.msra.mxu0 %v158_v1  ;;  %v160_v3 = vld [vmem:[%s210_s0] sm:$0xff]  }
   0x3   :  { %150 = vmatprep.subr.bf16.mxu0 %v165_v0  ;;  %v140_v12 = vld [vmem:[%s211_s2] ss:$0 sm:$0xff] }
   0x6   :  { %151 = vmatpush3.bf16.msra.mxu0 %v159_v2 }
   0x8   :  { %v22_v4 = vld [vmem:[#allocation2] sm:$0xff]  ;;  %v23_v8 = vld [vmem:[#allocation2 + $0x8] sm:$0xff] }
   0x9   :  { %153 = vmatmul.mubr.msk.bf16.vlgmr.msra.gmra.mxu0 %vm47_vm2, %v160_v3 }
  0xc9   :  { %v85_v5 = vpop.f32.mrf.mxu0 }
  0xca   :  { %v92_v6 = vadd.f32 %v85_v5, %v22_v4 }
  0xcb   :  { %v154_v7 = vpop.f32.mrf.mxu0 }
  0xcc   :  { %95 = vst.msk [vmem:[#allocation2] sm:$0xff] %vm19_vm0, %v92_v6 }
  0xcd   :  { %v88_v9 = vpop.f32.mrf.mxu0 }
  0xce   :  { %v93_v10 = vadd.f32 %v88_v9, %v23_v8 }
  0xcf   :  { %v155_v11 = vpop.f32.mrf.mxu0 }
  0xd0   :  { %96 = vst.msk [vmem:[#allocation2 + $0x8] sm:$0xff] %vm19_vm0, %v93_v10 }
  0xd3   :  { %v100_v13 = vld [vmem:[#allocation2] sm:$0xff] }
  0xd4   :  { %v109_v14 = vadd.f32 %v140_v12, %v100_v13 }
  0xd6   :  { %v113_v15 = vmul.f32 0.70710677, %v109_v14  ;;  %v111_v20 = vmul.f32 0.5, %v109_v14 }
  0xd7   :  { %v101_v16 = vld [vmem:[#allocation2 + $0x8] sm:$0xff] }
  0xd8   :  { %161 = verf.f32 %v113_v15  ;;  %v110_v17 = vadd.f32 %v140_v12, %v101_v16 }
  0xda   :  { %v114_v18 = vmul.f32 0.70710677, %v110_v17  ;;  %v112_v25 = vmul.f32 0.5, %v110_v17 }
  0xdc   :  { %163 = verf.f32 %v114_v18 }
  0xe5   :  { %v162_v19 = vpop.eup %161 }
  0xe6   :  { %v117_v21 = vadd.f32 1.0, %v162_v19 }
  0xe8   :  { %v119_v22 = vmul.f32 %v117_v21, %v111_v20 }
  0xe9   :  { %v164_v23 = vpop.eup %163 }
  0xea   :  { %v143_v24 = vpack.c.bf16 %v119_v22, %v119_v22  ;;  %v118_v26 = vadd.f32 1.0, %v164_v23 }
  0xec   :  { %130 = vst.msk [vmem:[%s212_s3] sm:$0xf] %vm129_vm3, %v143_v24  ;;  %v120_v27 = vmul.f32 %v118_v26, %v112_v25 }
  0xee   :  { %v144_v28 = vpack.c.bf16 %v120_v27, %v120_v27 }
  0xf0   :  { %131 = vst.msk [vmem:[%s212_s3 + $0x4] sm:$0xf] %vm129_vm3, %v144_v28 }

// kernel: bert_classifier_forward.25
= control target key start
LH: loop header
LB: loop body
LE: loop exit
PB: predicated region body
PF: predicated region fallthrough
CT: control target
= control target key end

     0   :  { %v136_v0 = vmov 0.0   ;;  %vm137_vm0 = vmmov 0   ;;  %vm46_vm1 = vcmask 261120   ;;  %s176_s1 = inlined_call_operand.vmem [shape: bf16[32,128], index: 1, kind: input, shape index: {}]   ;;  %s177_s0 = inlined_call_operand.vmem [shape: bf16[16,32], index: 0, kind: input, shape index: {}]   ;;  %s178_s2 = inlined_call_operand.vmem [shape: f32[1,128], index: 2, kind: input, shape index: {}]   ;;  %s179_s3 = inlined_call_operand.vmem [shape: f32[16,128], index: 3, kind: output, shape index: {}]  }
   0x1   :  { %123 = vmatprep.subr.bf16.mxu0 %v136_v0  ;;  %v133_v1 = vld [vmem:[%s176_s1 + $0x8] sm:$0xff]   ;;  %127 = vmatprep.mubr.msk.bf16.mxu0 %vm137_vm0, %v136_v0  ;;  %v134_v2 = vld [vmem:[%s176_s1] sm:$0xff]  }
   0x2   :  { %124 = vmatpush3.bf16.msra.mxu0 %v133_v1  ;;  %v135_v3 = vld [vmem:[%s177_s0] sm:$0xff]  }
   0x3   :  { %125 = vmatprep.subr.bf16.mxu0 %v136_v0  ;;  %v119_v4 = vld [vmem:[%s178_s2] ss:$0 sm:$0xff] }
   0x6   :  { %126 = vmatpush3.bf16.msra.mxu0 %v134_v2 }
   0x9   :  { %128 = vmatmul.mubr.msk.bf16.vlgmr.msra.gmra.mxu0 %vm46_vm1, %v135_v3 }
  0xc9   :  { %v84_v5 = vpop.f32.mrf.mxu0 }
  0xca   :  { %v107_v6 = vadd.f32 %v119_v4, %v84_v5 }
  0xcb   :  { %v129_v7 = vpop.f32.mrf.mxu0 }
  0xcc   :  { %109 = vst [vmem:[%s179_s3] sm:$0xff] %v107_v6 }
  0xcd   :  { %v87_v8 = vpop.f32.mrf.mxu0 }
  0xce   :  { %v108_v9 = vadd.f32 %v119_v4, %v87_v8 }
  0xcf   :  { %v130_v10 = vpop.f32.mrf.mxu0 }
  0xd0   :  { %110 = vst [vmem:[%s179_s3 + $0x8] sm:$0xff] %v108_v9 }

// kernel: bert_classifier_forward.24
= control target key start
LH: loop header
LB: loop body
LE: loop exit
PB: predicated region body
PF: predicated region fallthrough
CT: control target
= control target key end

     0   :  { %vm19_vm0 = vcmask 261120   ;;  %v164_v0 = vmov 0.0   ;;  %vm165_vm1 = vmmov 0   ;;  %vm128_vm2 = vcmask 257024   ;;  %s209_s1 = inlined_call_operand.vmem [shape: bf16[32,32], index: 1, kind: input, shape index: {}]   ;;  %s210_s0 = inlined_call_operand.vmem [shape: bf16[16,32], index: 0, kind: input, shape index: {}]   ;;  %s211_s2 = inlined_call_operand.vmem [shape: f32[1,32], index: 2, kind: input, shape index: {}]   ;;  %s212_s3 = inlined_call_operand.vmem [shape: bf16[16,32], index: 3, kind: output, shape index: {}]  }
   0x1   :  { %147 = vmatprep.subr.bf16.mxu0 %v164_v0  ;;  %v157_v1 = vld [vmem:[%s209_s1 + $0x8] sm:$0xff]   ;;  %151 = vmatprep.mubr.msk.bf16.mxu0 %vm165_vm1, %v164_v0  ;;  %20 = vst.msk [vmem:[#allocation2] sm:$0xff] %vm19_vm0, %v164_v0  ;;  %21 = vst.msk [vmem:[#allocation2 + $0x8] sm:$0xff] %vm19_vm0, %v164_v0  ;;  %v158_v2 = vld [vmem:[%s209_s1] sm:$0xff]  }
   0x2   :  { %148 = vmatpush3.bf16.msra.mxu0 %v157_v1  ;;  %v159_v3 = vld [vmem:[%s210_s0] sm:$0xff]  }
   0x3   :  { %149 = vmatprep.subr.bf16.mxu0 %v164_v0  ;;  %v139_v12 = vld [vmem:[%s211_s2] ss:$0 sm:$0xff] }
   0x6   :  { %150 = vmatpush3.bf16.msra.mxu0 %v158_v2 }
   0x8   :  { %v22_v4 = vld [vmem:[#allocation2] sm:$0xff]  ;;  %v23_v8 = vld [vmem:[#allocation2 + $0x8] sm:$0xff] }
   0x9   :  { %152 = vmatmul.mubr.msk.bf16.vlgmr.msra.gmra.mxu0 %vm19_vm0, %v159_v3 }
  0xc9   :  { %v85_v5 = vpop.f32.mrf.mxu0 }
  0xca   :  { %v92_v6 = vadd.f32 %v85_v5, %v22_v4 }
  0xcb   :  { %v153_v7 = vpop.f32.mrf.mxu0 }
  0xcc   :  { %94 = vst.msk [vmem:[#allocation2] sm:$0xff] %vm19_vm0, %v92_v6 }
  0xcd   :  { %v88_v9 = vpop.f32.mrf.mxu0 }
  0xce   :  { %v93_v10 = vadd.f32 %v88_v9, %v23_v8 }
  0xcf   :  { %v154_v11 = vpop.f32.mrf.mxu0 }
  0xd0   :  { %95 = vst.msk [vmem:[#allocation2 + $0x8] sm:$0xff] %vm19_vm0, %v93_v10 }
  0xd3   :  { %v99_v13 = vld [vmem:[#allocation2] sm:$0xff] }
  0xd4   :  { %v108_v14 = vadd.f32 %v139_v12, %v99_v13 }
  0xd6   :  { %v112_v15 = vmul.f32 0.70710677, %v108_v14  ;;  %v110_v20 = vmul.f32 0.5, %v108_v14 }
  0xd7   :  { %v100_v16 = vld [vmem:[#allocation2 + $0x8] sm:$0xff] }
  0xd8   :  { %160 = verf.f32 %v112_v15  ;;  %v109_v17 = vadd.f32 %v139_v12, %v100_v16 }
  0xda   :  { %v113_v18 = vmul.f32 0.70710677, %v109_v17  ;;  %v111_v25 = vmul.f32 0.5, %v109_v17 }
  0xdc   :  { %162 = verf.f32 %v113_v18 }
  0xe5   :  { %v161_v19 = vpop.eup %160 }
  0xe6   :  { %v116_v21 = vadd.f32 1.0, %v161_v19 }
  0xe8   :  { %v118_v22 = vmul.f32 %v116_v21, %v110_v20 }
  0xe9   :  { %v163_v23 = vpop.eup %162 }
  0xea   :  { %v142_v24 = vpack.c.bf16 %v118_v22, %v118_v22  ;;  %v117_v26 = vadd.f32 1.0, %v163_v23 }
  0xec   :  { %129 = vst.msk [vmem:[%s212_s3] sm:$0xf] %vm128_vm2, %v142_v24  ;;  %v119_v27 = vmul.f32 %v117_v26, %v111_v25 }
  0xee   :  { %v143_v28 = vpack.c.bf16 %v119_v27, %v119_v27 }
  0xf0   :  { %130 = vst.msk [vmem:[%s212_s3 + $0x4] sm:$0xf] %vm128_vm2, %v143_v28 }

// kernel: bert_classifier_forward.18
= control target key start
LH: loop header
LB: loop body
LE: loop exit
PB: predicated region body
PF: predicated region fallthrough
CT: control target
= control target key end

     0   :  { %vm28_vm0 = vcmask 261120   ;;  %v247_v0 = vmov 0.0   ;;  %vm248_vm1 = vmmov 0   ;;  %vm72_vm2 = vcmask 523264   ;;  %s325_s1 = inlined_call_operand.vmem [shape: bf16[64,32], index: 1, kind: input, shape index: {}]   ;;  %s326_s0 = inlined_call_operand.vmem [shape: bf16[16,64], index: 0, kind: input, shape index: {}]   ;;  %s327_s3 = inlined_call_operand.vmem [shape: bf16[16,32], index: 3, kind: input, shape index: {}]   ;;  %s328_s2 = inlined_call_operand.vmem [shape: f32[1,32], index: 2, kind: input, shape index: {}]   ;;  %s329_s4 = inlined_call_operand.vmem [shape: f32[1,32], index: 4, kind: input, shape index: {}]   ;;  %s330_s5 = inlined_call_operand.vmem [shape: f32[1,32], index: 5, kind: input, shape index: {}]   ;;  %s331_s6 = inlined_call_operand.vmem [shape: bf16[16,32], index: 6, kind: output, shape index: {}]  }
   0x1   :  { %224 = vmatprep.subr.bf16.mxu0 %v247_v0  ;;  %v238_v1 = vld [vmem:[%s325_s1 + $0x18] sm:$0xff]   ;;  %232 = vmatprep.mubr.msk.bf16.mxu0 %vm248_vm1, %v247_v0  ;;  %29 = vst.msk [vmem:[#allocation2] sm:$0xff] %vm28_vm0, %v247_v0  ;;  %30 = vst.msk [vmem:[#allocation2 + $0x8] sm:$0xff] %vm28_vm0, %v247_v0  ;;  %v239_v2 = vld [vmem:[%s325_s1 + $0x10] sm:$0xff]   ;;  %vm195_vm3 = vcmask 257024  }
   0x2   :  { %225 = vmatpush3.bf16.msra.mxu0 %v238_v1  ;;  %v240_v3 = vld [vmem:[%s325_s1 + $0x8] sm:$0xff]   ;;  %v241_v4 = vld [vmem:[%s325_s1] sm:$0xff]  }
   0x3   :  { %226 = vmatprep.subr.bf16.mxu0 %v247_v0  ;;  %v242_v5 = vld [vmem:[%s326_s0] sm:$0xff]  }
   0x4   :  { %v216_v14 = vld [vmem:[%s327_s3] sm:$0xff]  }
   0x5   :  { %v208_v15 = vld [vmem:[%s328_s2] ss:$0 sm:$0xff]  ;;  %v217_v16 = vunpack.c.l.bf16 %v216_v14  ;;  %v218_v20 = vunpack.c.h.bf16 %v216_v14 }
   0x6   :  { %227 = vmatpush3.bf16.msra.mxu0 %v239_v2  ;;  %v209_v43 = vld [vmem:[%s329_s4] ss:$0 sm:$0xff] }
   0x7   :  { %228 = vmatprep.subr.bf16.mxu0 %v247_v0  ;;  %v210_v45 = vld [vmem:[%s330_s5] ss:$0 sm:$0xff] }
   0x8   :  { %v31_v6 = vld [vmem:[#allocation2] sm:$0xff]  ;;  %v32_v10 = vld [vmem:[#allocation2 + $0x8] sm:$0xff] }
   0xa   :  { %229 = vmatpush3.bf16.msra.mxu0 %v240_v3 }
   0xb   :  { %230 = vmatprep.subr.bf16.mxu0 %v247_v0 }
   0xe   :  { %231 = vmatpush3.bf16.msra.mxu0 %v241_v4 }
  0x11   :  { %233 = vmatmul.mubr.msk.bf16.vlgmr.msra.gmra.mxu0 %vm72_vm2, %v242_v5 }
  0xd1   :  { %v110_v7 = vpop.f32.mrf.mxu0 }
  0xd2   :  { %v117_v8 = vadd.f32 %v110_v7, %v31_v6 }
  0xd3   :  { %v234_v9 = vpop.f32.mrf.mxu0 }
  0xd4   :  { %120 = vst.msk [vmem:[#allocation2] sm:$0xff] %vm28_vm0, %v117_v8 }
  0xd5   :  { %v113_v11 = vpop.f32.mrf.mxu0 }
  0xd6   :  { %v118_v12 = vadd.f32 %v113_v11, %v32_v10 }
  0xd7   :  { %v235_v13 = vpop.f32.mrf.mxu0 }
  0xd8   :  { %121 = vst.msk [vmem:[#allocation2 + $0x8] sm:$0xff] %vm28_vm0, %v118_v12 }
  0xdb   :  { %v125_v17 = vld [vmem:[#allocation2] sm:$0xff] }
  0xdc   :  { %v134_v18 = vadd.f32 %v208_v15, %v125_v17 }
  0xde   :  { %v140_v19 = vadd.f32 %v217_v16, %v134_v18 }
  0xdf   :  { %v126_v21 = vld [vmem:[#allocation2 + $0x8] sm:$0xff] }
  0xe0   :  { %v142_v22 = vsel %vm28_vm0, %v140_v19, 0.0  ;;  %v135_v23 = vadd.f32 %v208_v15, %v126_v21 }
  0xe1   :  { %143 = vadd.xlane.f32.xlu0 %v142_v22 }
  0xe2   :  { %v141_v24 = vadd.f32 %v218_v20, %v135_v23 }
  0xe4   :  { %v145_v25 = vsel %vm28_vm0, %v141_v24, 0.0 }
  0xe5   :  { %146 = vadd.xlane.f32.xlu0 %v145_v25 }
 0x16a   :  { %v144_v26 = vpop.xlane.xlu0 %143 }
 0x16b   :  { %v149_v27 = vmul.f32 0.03125, %v144_v26 }
 0x16d   :  { %v151_v28 = vsub.f32 %v140_v19, %v149_v27 }
 0x16e   :  { %v147_v29 = vpop.xlane.xlu0 %146 }
 0x16f   :  { %v150_v30 = vmul.f32 0.03125, %v147_v29  ;;  %v153_v31 = vmul.f32 %v151_v28, %v151_v28 }
 0x171   :  { %v152_v32 = vsub.f32 %v141_v24, %v150_v30  ;;  %v155_v33 = vsel %vm28_vm0, %v153_v31, 0.0 }
 0x172   :  { %156 = vadd.xlane.f32.xlu1 %v155_v33 }
 0x173   :  { %v154_v34 = vmul.f32 %v152_v32, %v152_v32 }
 0x175   :  { %v158_v35 = vsel %vm28_vm0, %v154_v34, 0.0 }
 0x176   :  { %159 = vadd.xlane.f32.xlu1 %v158_v35 }
 0x1fb   :  { %v157_v36 = vpop.xlane.xlu1 %156 }
 0x1fc   :  { %v161_v37 = vmul.f32 0.03125, %v157_v36 }
 0x1fe   :  { %v163_v38 = vadd.f32 1e-12, %v161_v37 }
 0x1ff   :  { %v160_v39 = vpop.xlane.xlu1 %159 }
 0x200   :  { %243 = vrsqrt.f32 %v163_v38  ;;  %v162_v40 = vmul.f32 0.03125, %v160_v39 }
 0x202   :  { %v164_v41 = vadd.f32 1e-12, %v162_v40 }
 0x204   :  { %245 = vrsqrt.f32 %v164_v41 }
 0x20d   :  { %v244_v42 = vpop.eup %243 }
 0x20e   :  { %v167_v44 = vmul.f32 %v244_v42, %v151_v28 }
 0x210   :  { %v176_v46 = vmul.f32 %v209_v43, %v167_v44 }
 0x211   :  { %v246_v47 = vpop.eup %245 }
 0x212   :  { %v185_v48 = vadd.f32 %v210_v45, %v176_v46  ;;  %v168_v49 = vmul.f32 %v246_v47, %v152_v32 }
 0x214   :  { %v213_v50 = vpack.c.bf16 %v185_v48, %v185_v48  ;;  %v177_v51 = vmul.f32 %v209_v43, %v168_v49 }
 0x216   :  { %196 = vst.msk [vmem:[%s331_s6] sm:$0xf] %vm195_vm3, %v213_v50  ;;  %v186_v52 = vadd.f32 %v210_v45, %v177_v51 }
 0x218   :  { %v214_v53 = vpack.c.bf16 %v186_v52, %v186_v52 }
 0x21a   :  { %197 = vst.msk [vmem:[%s331_s6 + $0x4] sm:$0xf] %vm195_vm3, %v214_v53 }

</bundles_post_ra>
